<compile_context>
chip_gen: v7x
topology: tpu7x:2x2x1
jax: 0.10.0
libtpu: 0.0.40
codegen_flags: <defaults>
</compile_context>

<pallas_src>
import functools
import math

import jax
import jax.numpy as jnp
from jax import lax
from jax.experimental import pallas as pl
from jax.experimental.pallas import tpu as pltpu


# ----------------------------------------------------------------------------
# Config (toy sizes consistent with the reference module)
# ----------------------------------------------------------------------------

class Config:
    dim = 64
    n_layers = 2
    n_heads = 4
    n_kv_heads = 2
    vocab_size = 128
    multiple_of = 32
    ffn_dim_multiplier = None
    norm_eps = 1e-5
    rope_theta = 500000.0
    max_seq_len = 16

    head_dim = dim // n_heads
    n_rep = n_heads // n_kv_heads

    @staticmethod
    def ffn_hidden():
        hidden = int(2 * (4 * Config.dim) / 3)
        if Config.ffn_dim_multiplier is not None:
            hidden = int(Config.ffn_dim_multiplier * hidden)
        return Config.multiple_of * (
            (hidden + Config.multiple_of - 1) // Config.multiple_of)


# ----------------------------------------------------------------------------
# Shared in-kernel helpers
# ----------------------------------------------------------------------------

def _rmsnorm_f32(x, w, eps):
    # x: (rows, D) f32 ; w: (1, D) f32
    ms = jnp.mean(x * x, axis=-1, keepdims=True)
    return x * lax.rsqrt(ms + eps) * w


# ----------------------------------------------------------------------------
# Fused attention-block kernel (one grid step per batch element)
# ----------------------------------------------------------------------------

def _attn_block_kernel(x_ref, nw_ref, wqkv_ref, wo_ref, cos_ref, sin_ref,
                       swap_ref, o_ref, *, n_heads, n_kv_heads, head_dim, eps):
    n_rep = n_heads // n_kv_heads
    dq = n_heads * head_dim
    dkv = n_kv_heads * head_dim
    scale = 1.0 / math.sqrt(head_dim)

    x = x_ref[0].astype(jnp.float32)                       # (S, D) residual in
    xn = _rmsnorm_f32(x, nw_ref[...], eps)                 # (S, D) f32

    # Fused QKV projection: bf16 operands, f32 accumulation, 128-lane output.
    qkv = jnp.dot(xn.astype(jnp.bfloat16), wqkv_ref[...],
                  preferred_element_type=jnp.float32)      # (S, dq + 2*dkv)
    q = qkv[:, :dq]
    k = qkv[:, dq:dq + dkv]
    v = qkv[:, dq + dkv:]

    # RoPE (interleaved-pair form): out = x*cos + pairswap(x)*sin.
    # pairswap is an exact +-1/0 block-diagonal permutation applied on the MXU.
    cos = cos_ref[...]                                     # (S, dq)
    sin = sin_ref[...]
    swap = swap_ref[...]                                   # (dq, dq)
    q = q * cos + jnp.dot(q, swap, preferred_element_type=jnp.float32) * sin
    k = (k * cos[:, :dkv]
         + jnp.dot(k, swap[:dkv, :dkv],
                   preferred_element_type=jnp.float32) * sin[:, :dkv])

    # Causal mask built in-kernel (no HBM mask operand).
    S = x.shape[0]
    row = lax.broadcasted_iota(jnp.int32, (S, S), 0)
    col = lax.broadcasted_iota(jnp.int32, (S, S), 1)
    causal = col <= row

    heads_out = []
    for h in range(n_heads):                               # static unroll
        kvh = h // n_rep                                   # GQA mapping
        qh = q[:, h * head_dim:(h + 1) * head_dim].astype(jnp.bfloat16)
        kh = k[:, kvh * head_dim:(kvh + 1) * head_dim].astype(jnp.bfloat16)
        vh = v[:, kvh * head_dim:(kvh + 1) * head_dim].astype(jnp.bfloat16)
        # scores = q @ k^T  (contract last dims; no explicit transpose)
        s = lax.dot_general(qh, kh, (((1,), (1,)), ((), ())),
                            preferred_element_type=jnp.float32) * scale
        s = jnp.where(causal, s, -1e30)
        s = s - jnp.max(s, axis=-1, keepdims=True)
        p = jnp.exp(s)
        p = p * pl.reciprocal(jnp.sum(p, axis=-1, keepdims=True), approx=True)
        heads_out.append(jnp.dot(p.astype(jnp.bfloat16), vh,
                                 preferred_element_type=jnp.float32))
    attn = jnp.concatenate(heads_out, axis=-1)             # (S, dq) f32

    out = jnp.dot(attn.astype(jnp.bfloat16), wo_ref[...],
                  preferred_element_type=jnp.float32)      # (S, D)
    o_ref[0] = (x + out).astype(o_ref.dtype)               # residual add


def attention_block(x, norm_w, wqkv, wo, cos_q, sin_q, swap, cfg):
    B, S, D = x.shape
    kernel = functools.partial(
        _attn_block_kernel, n_heads=cfg.n_heads, n_kv_heads=cfg.n_kv_heads,
        head_dim=cfg.head_dim, eps=cfg.norm_eps)
    return pl.pallas_call(
        kernel,
        out_shape=jax.ShapeDtypeStruct((B, S, D), x.dtype),
        grid=(B,),
        in_specs=[
            pl.BlockSpec((1, S, D), lambda b: (b, 0, 0)),
            pl.BlockSpec((1, D), lambda b: (0, 0)),
            pl.BlockSpec(wqkv.shape, lambda b: (0, 0)),
            pl.BlockSpec(wo.shape, lambda b: (0, 0)),
            pl.BlockSpec(cos_q.shape, lambda b: (0, 0)),
            pl.BlockSpec(sin_q.shape, lambda b: (0, 0)),
            pl.BlockSpec(swap.shape, lambda b: (0, 0)),
        ],
        out_specs=pl.BlockSpec((1, S, D), lambda b: (b, 0, 0)),
        compiler_params=pltpu.CompilerParams(
            dimension_semantics=("parallel",)),
    )(x, norm_w.reshape(1, D), wqkv, wo, cos_q, sin_q, swap)


# ----------------------------------------------------------------------------
# Fused FFN-block kernel (RMSNorm + [w1|w3] + SwiGLU + w2 + residual)
# ----------------------------------------------------------------------------

def _ffn_block_kernel(x_ref, nw_ref, w13_ref, w2_ref, o_ref, *, hidden, eps):
    x = x_ref[...].astype(jnp.float32)                     # (TR, D)
    xn = _rmsnorm_f32(x, nw_ref[...], eps)
    a13 = jnp.dot(xn.astype(jnp.bfloat16), w13_ref[...],
                  preferred_element_type=jnp.float32)      # (TR, 2*hidden)
    a = a13[:, :hidden]
    b = a13[:, hidden:]
    g = a * jax.nn.sigmoid(a) * b                          # SiLU(a) * b, f32
    out = jnp.dot(g.astype(jnp.bfloat16), w2_ref[...],
                  preferred_element_type=jnp.float32)      # (TR, D)
    o_ref[...] = (x + out).astype(o_ref.dtype)             # residual add


def ffn_block(x2d, norm_w, w13, w2, hidden, eps):
    R, D = x2d.shape
    TR = 256 if (R % 256 == 0) else R                      # one step at toy size
    kernel = functools.partial(_ffn_block_kernel, hidden=hidden, eps=eps)
    return pl.pallas_call(
        kernel,
        out_shape=jax.ShapeDtypeStruct((R, D), x2d.dtype),
        grid=(R // TR,),
        in_specs=[
            pl.BlockSpec((TR, D), lambda i: (i, 0)),
            pl.BlockSpec((1, D), lambda i: (0, 0)),
            pl.BlockSpec(w13.shape, lambda i: (0, 0)),
            pl.BlockSpec(w2.shape, lambda i: (0, 0)),
        ],
        out_specs=pl.BlockSpec((TR, D), lambda i: (i, 0)),
        compiler_params=pltpu.CompilerParams(
            dimension_semantics=("parallel",)),
    )(x2d, norm_w.reshape(1, D), w13, w2)


# ----------------------------------------------------------------------------
# Final RMSNorm + output projection kernel (lane-dense 128-wide vocab output)
# ----------------------------------------------------------------------------

def _final_kernel(x_ref, nw_ref, wout_ref, o_ref, *, eps):
    x = x_ref[...].astype(jnp.float32)
    xn = _rmsnorm_f32(x, nw_ref[...], eps)
    o_ref[...] = jnp.dot(xn.astype(jnp.bfloat16), wout_ref[...],
                         preferred_element_type=jnp.float32)


def final_norm_output(x2d, norm_w, wout, eps):
    R, D = x2d.shape
    V = wout.shape[1]
    TR = 256 if (R % 256 == 0) else R
    kernel = functools.partial(_final_kernel, eps=eps)
    return pl.pallas_call(
        kernel,
        out_shape=jax.ShapeDtypeStruct((R, V), jnp.float32),
        grid=(R // TR,),
        in_specs=[
            pl.BlockSpec((TR, D), lambda i: (i, 0)),
            pl.BlockSpec((1, D), lambda i: (0, 0)),
            pl.BlockSpec(wout.shape, lambda i: (0, 0)),
        ],
        out_specs=pl.BlockSpec((TR, V), lambda i: (i, 0)),
        compiler_params=pltpu.CompilerParams(
            dimension_semantics=("parallel",)),
    )(x2d, norm_w.reshape(1, D), wout)


# ----------------------------------------------------------------------------
# RoPE tables (no complex numbers)
# ----------------------------------------------------------------------------

def rope_tables(head_dim, max_len, theta):
    half = head_dim // 2
    freqs = 1.0 / theta ** (jnp.arange(0, head_dim, 2)[:half].astype(
        jnp.float32) / head_dim)
    t = jnp.arange(max_len, dtype=jnp.float32)
    ang = jnp.outer(t, freqs)                               # (max_len, half)
    # interleave-duplicated so cos[:, 2i] == cos[:, 2i+1] == cos(freq_i * t)
    cos = jnp.repeat(jnp.cos(ang), 2, axis=-1)              # (max_len, head_dim)
    sin = jnp.repeat(jnp.sin(ang), 2, axis=-1)
    return cos, sin


def rope_swap_matrix(n_heads, head_dim):
    # pairswap(x)[2i] = -x[2i+1]; pairswap(x)[2i+1] = x[2i], per head block.
    half = head_dim // 2
    idx = jnp.arange(half)
    p = jnp.zeros((head_dim, head_dim), jnp.float32)
    p = p.at[2 * idx + 1, 2 * idx].set(-1.0)
    p = p.at[2 * idx, 2 * idx + 1].set(1.0)
    return jnp.kron(jnp.eye(n_heads, dtype=jnp.float32), p)


# ----------------------------------------------------------------------------
# Parameters & forward pass
# ----------------------------------------------------------------------------

def init_params(key):
    cfg = Config
    hidden = cfg.ffn_hidden()
    hd = cfg.head_dim

    def w(key, shape, scale=0.02):
        return scale * jax.random.normal(key, shape, jnp.float32)

    keys = jax.random.split(key, 2 + 7 * cfg.n_layers)
    params = {
        "tok_embeddings": w(keys[0], (cfg.vocab_size, cfg.dim)),
        # linear weights stored (in_features, out_features), bf16 for the MXU
        "output": w(keys[1], (cfg.dim, cfg.vocab_size)).astype(jnp.bfloat16),
        "norm_w": jnp.ones((cfg.dim,), jnp.float32),
        "layers": [],
    }
    for l in range(cfg.n_layers):
        k = keys[2 + 7 * l: 2 + 7 * (l + 1)]
        wq = w(k[0], (cfg.dim, cfg.n_heads * hd))
        wk = w(k[1], (cfg.dim, cfg.n_kv_heads * hd))
        wv = w(k[2], (cfg.dim, cfg.n_kv_heads * hd))
        w1 = w(k[4], (cfg.dim, hidden))
        w3 = w(k[5], (cfg.dim, hidden))
        params["layers"].append({
            "wqkv": jnp.concatenate([wq, wk, wv], axis=1).astype(jnp.bfloat16),
            "wo": w(k[3], (cfg.n_heads * hd, cfg.dim)).astype(jnp.bfloat16),
            "w13": jnp.concatenate([w1, w3], axis=1).astype(jnp.bfloat16),
            "w2": w(k[6], (hidden, cfg.dim)).astype(jnp.bfloat16),
            "attn_norm_w": jnp.ones((cfg.dim,), jnp.float32),
            "ffn_norm_w": jnp.ones((cfg.dim,), jnp.float32),
        })
    return params


def transformer_forward(params, tokens, start_pos=0):
    cfg = Config
    B, S = tokens.shape
    D, hd = cfg.dim, cfg.head_dim
    hidden = cfg.ffn_hidden()

    # TODO(synk): token-embedding gather kept in plain JAX (no clean Pallas
    # gather win at this scale).
    h = jnp.take(params["tok_embeddings"], tokens, axis=0).astype(jnp.float32)

    # RoPE tables (tiny, computed once per forward, shared by all layers).
    cos_full, sin_full = rope_tables(hd, cfg.max_seq_len * 2, cfg.rope_theta)
    cos = cos_full[start_pos:start_pos + S]                 # (S, hd)
    sin = sin_full[start_pos:start_pos + S]
    cos_q = jnp.tile(cos, (1, cfg.n_heads))                 # (S, n_heads*hd)
    sin_q = jnp.tile(sin, (1, cfg.n_heads))
    swap = rope_swap_matrix(cfg.n_heads, hd)                # (n_heads*hd,)**2

    # TODO(synk): no KV-cache decode path for start_pos > 0 (the reference
    # module as given has no cache either); causal masking is done in-kernel.

    for layer in params["layers"]:
        h = attention_block(h, layer["attn_norm_w"], layer["wqkv"],
                            layer["wo"], cos_q, sin_q, swap, cfg)
        h2 = ffn_block(h.reshape(B * S, D), layer["ffn_norm_w"],
                       layer["w13"], layer["w2"], hidden, cfg.norm_eps)
        h = h2.reshape(B, S, D)

    logits = final_norm_output(h.reshape(B * S, D), params["norm_w"],
                               params["output"], cfg.norm_eps)
    return logits.reshape(B, S, cfg.vocab_size)


# ----------------------------------------------------------------------------

if __name__ == "__main__":
    key = jax.random.PRNGKey(0)
    pkey, tkey = jax.random.split(key)

    params = init_params(pkey)

    batch, seqlen = 2, 8
    tokens = jax.random.randint(tkey, (batch, seqlen), 0, Config.vocab_size,
                                dtype=jnp.int32)

    fwd = jax.jit(functools.partial(transformer_forward, start_pos=0))
    logits = fwd(params, tokens)
    jax.block_until_ready(logits)

    assert logits.shape == (batch, seqlen, Config.vocab_size)
    assert logits.dtype == jnp.float32
    assert bool(jnp.all(jnp.isfinite(logits)))
    print("KERNEL_OK")
</pallas_src>

<mosaic_0001>
module attributes {stable_mosaic.version = 11 : i64} {
  func.func @_ffn_block_kernel(%arg0: i32, %arg1: memref<16x64xf32, #tpu.memory_space<vmem>>, %arg2: memref<1x64xf32, #tpu.memory_space<vmem>>, %arg3: memref<64x384xbf16, #tpu.memory_space<vmem>>, %arg4: memref<192x64xbf16, #tpu.memory_space<vmem>>, %arg5: memref<16x64xf32, #tpu.memory_space<vmem>>) attributes {dimension_semantics = [#tpu.dimension_semantics<parallel>], iteration_bounds = array<i64: 1>, scalar_prefetch = 0 : i64, scratch_operands = 0 : i64, tpu.core_type = #tpu.core_type<tc>, window_params = [{transform_indices = @transform_0, window_bounds = array<i64: 16, 64>}, {pipeline_mode = #tpu.pipeline_mode<synchronous>, transform_indices = @transform_1, window_bounds = array<i64: 1, 64>}, {pipeline_mode = #tpu.pipeline_mode<synchronous>, transform_indices = @transform_2, window_bounds = array<i64: 64, 384>}, {pipeline_mode = #tpu.pipeline_mode<synchronous>, transform_indices = @transform_3, window_bounds = array<i64: 192, 64>}, {transform_indices = @transform_4, window_bounds = array<i64: 16, 64>}]} {
    %c0 = arith.constant 0 : index
    %c0_0 = arith.constant 0 : index
    %0 = vector.load %arg1[%c0, %c0_0] : memref<16x64xf32, #tpu.memory_space<vmem>>, vector<16x64xf32>
    %c0_1 = arith.constant 0 : index
    %c0_2 = arith.constant 0 : index
    %1 = vector.load %arg2[%c0_1, %c0_2] : memref<1x64xf32, #tpu.memory_space<vmem>>, vector<1x64xf32>
    %2 = arith.mulf %0, %0 : vector<16x64xf32>
    %cst = arith.constant dense<0.000000e+00> : vector<16xf32>
    %3 = vector.multi_reduction <add>, %2, %cst [1] : vector<16x64xf32> to vector<16xf32>
    %4 = vector.shape_cast %3 : vector<16xf32> to vector<16x1xf32>
    %cst_3 = arith.constant 6.400000e+01 : f32
    %5 = vector.broadcast %cst_3 : f32 to vector<16x1xf32>
    %6 = arith.divf %4, %5 : vector<16x1xf32>
    %cst_4 = arith.constant 9.99999974E-6 : f32
    %7 = vector.broadcast %cst_4 : f32 to vector<16x1xf32>
    %8 = arith.addf %6, %7 : vector<16x1xf32>
    %9 = math.rsqrt %8 : vector<16x1xf32>
    %10 = vector.broadcast %9 : vector<16x1xf32> to vector<16x64xf32>
    %11 = arith.mulf %0, %10 : vector<16x64xf32>
    %12 = vector.broadcast %1 : vector<1x64xf32> to vector<16x64xf32>
    %13 = arith.mulf %11, %12 : vector<16x64xf32>
    %14 = arith.truncf %13 : vector<16x64xf32> to vector<16x64xbf16>
    %c0_5 = arith.constant 0 : index
    %c0_6 = arith.constant 0 : index
    %15 = vector.load %arg3[%c0_5, %c0_6] : memref<64x384xbf16, #tpu.memory_space<vmem>>, vector<64x384xbf16>
    %cst_7 = arith.constant dense<0.000000e+00> : vector<16x384xf32>
    %16 = tpu.matmul %14, %15, %cst_7 {dimension_numbers = #tpu.dot_dimension_numbers<[1], [0], [0], [1], [0, 0, 1, 1], [], []>} : vector<16x64xbf16>, vector<64x384xbf16>, vector<16x384xf32> -> vector<16x384xf32>
    %17 = vector.extract_strided_slice %16 {offsets = [0, 0], sizes = [16, 192], strides = [1, 1]} : vector<16x384xf32> to vector<16x192xf32>
    %18 = vector.extract_strided_slice %16 {offsets = [0, 192], sizes = [16, 192], strides = [1, 1]} : vector<16x384xf32> to vector<16x192xf32>
    %19 = arith.negf %17 : vector<16x192xf32>
    %20 = math.exp %19 : vector<16x192xf32>
    %cst_8 = arith.constant 1.000000e+00 : f32
    %21 = vector.broadcast %cst_8 : f32 to vector<16x192xf32>
    %22 = arith.addf %21, %20 : vector<16x192xf32>
    %23 = arith.divf %21, %22 : vector<16x192xf32>
    %24 = arith.mulf %17, %23 : vector<16x192xf32>
    %25 = arith.mulf %24, %18 : vector<16x192xf32>
    %26 = arith.truncf %25 : vector<16x192xf32> to vector<16x192xbf16>
    %c0_9 = arith.constant 0 : index
    %c0_10 = arith.constant 0 : index
    %27 = vector.load %arg4[%c0_9, %c0_10] : memref<192x64xbf16, #tpu.memory_space<vmem>>, vector<192x64xbf16>
    %cst_11 = arith.constant dense<0.000000e+00> : vector<16x64xf32>
    %28 = tpu.matmul %26, %27, %cst_11 {dimension_numbers = #tpu.dot_dimension_numbers<[1], [0], [0], [1], [0, 0, 1, 1], [], []>} : vector<16x192xbf16>, vector<192x64xbf16>, vector<16x64xf32> -> vector<16x64xf32>
    %29 = arith.addf %0, %28 : vector<16x64xf32>
    %c0_12 = arith.constant 0 : index
    %c0_13 = arith.constant 0 : index
    %30 = vector.load %arg5[%c0_12, %c0_13] : memref<16x64xf32, #tpu.memory_space<vmem>>, vector<16x64xf32>
    tpu.vector_store %arg5[%c0_12, %c0_13], %29 {strides = array<i32>} : memref<16x64xf32, #tpu.memory_space<vmem>>, vector<16x64xf32>,
    return
  }
  func.func @transform_0(%arg0: i32) -> (i32, i32) {
    %c0_i32 = arith.constant 0 : i32
    %c0_i32_0 = arith.constant 0 : i32
    return %arg0, %c0_i32 : i32, i32
  }
  func.func @transform_1(%arg0: i32) -> (i32, i32) {
    %c0_i32 = arith.constant 0 : i32
    %c0_i32_0 = arith.constant 0 : i32
    %c0_i32_1 = arith.constant 0 : i32
    return %c0_i32, %c0_i32_0 : i32, i32
  }
  func.func @transform_2(%arg0: i32) -> (i32, i32) {
    %c0_i32 = arith.constant 0 : i32
    %c0_i32_0 = arith.constant 0 : i32
    %c0_i32_1 = arith.constant 0 : i32
    return %c0_i32, %c0_i32_0 : i32, i32
  }
  func.func @transform_3(%arg0: i32) -> (i32, i32) {
    %c0_i32 = arith.constant 0 : i32
    %c0_i32_0 = arith.constant 0 : i32
    %c0_i32_1 = arith.constant 0 : i32
    return %c0_i32, %c0_i32_0 : i32, i32
  }
  func.func @transform_4(%arg0: i32) -> (i32, i32) {
    %c0_i32 = arith.constant 0 : i32
    %c0_i32_0 = arith.constant 0 : i32
    return %arg0, %c0_i32 : i32, i32
  }
}

module attributes {stable_mosaic.version = 11 : i64} {
  func.func @_attn_block_kernel(%arg0: i32, %arg1: memref<1x8x64xf32, #tpu.memory_space<vmem>>, %arg2: memref<1x64xf32, #tpu.memory_space<vmem>>, %arg3: memref<64x128xbf16, #tpu.memory_space<vmem>>, %arg4: memref<64x64xbf16, #tpu.memory_space<vmem>>, %arg5: memref<8x64xf32, #tpu.memory_space<vmem>>, %arg6: memref<8x64xf32, #tpu.memory_space<vmem>>, %arg7: memref<64x64xf32, #tpu.memory_space<vmem>>, %arg8: memref<1x8x64xf32, #tpu.memory_space<vmem>>) attributes {dimension_semantics = [#tpu.dimension_semantics<parallel>], iteration_bounds = array<i64: 2>, scalar_prefetch = 0 : i64, scratch_operands = 0 : i64, tpu.core_type = #tpu.core_type<tc>, window_params = [{transform_indices = @transform_0, window_bounds = array<i64: 1, 8, 64>}, {pipeline_mode = #tpu.pipeline_mode<synchronous>, transform_indices = @transform_1, window_bounds = array<i64: 1, 64>}, {pipeline_mode = #tpu.pipeline_mode<synchronous>, transform_indices = @transform_2, window_bounds = array<i64: 64, 128>}, {pipeline_mode = #tpu.pipeline_mode<synchronous>, transform_indices = @transform_3, window_bounds = array<i64: 64, 64>}, {pipeline_mode = #tpu.pipeline_mode<synchronous>, transform_indices = @transform_4, window_bounds = array<i64: 8, 64>}, {pipeline_mode = #tpu.pipeline_mode<synchronous>, transform_indices = @transform_5, window_bounds = array<i64: 8, 64>}, {pipeline_mode = #tpu.pipeline_mode<synchronous>, transform_indices = @transform_6, window_bounds = array<i64: 64, 64>}, {transform_indices = @transform_7, window_bounds = array<i64: 1, 8, 64>}]} {
    %c0 = arith.constant 0 : index
    %c0_0 = arith.constant 0 : index
    %c0_1 = arith.constant 0 : index
    %0 = vector.load %arg1[%c0, %c0_0, %c0_1] : memref<1x8x64xf32, #tpu.memory_space<vmem>>, vector<1x8x64xf32>
    %1 = vector.shape_cast %0 : vector<1x8x64xf32> to vector<8x64xf32>
    %c0_2 = arith.constant 0 : index
    %c0_3 = arith.constant 0 : index
    %2 = vector.load %arg2[%c0_2, %c0_3] : memref<1x64xf32, #tpu.memory_space<vmem>>, vector<1x64xf32>
    %3 = arith.mulf %1, %1 : vector<8x64xf32>
    %cst = arith.constant dense<0.000000e+00> : vector<8xf32>
    %4 = vector.multi_reduction <add>, %3, %cst [1] : vector<8x64xf32> to vector<8xf32>
    %5 = vector.shape_cast %4 : vector<8xf32> to vector<8x1xf32>
    %cst_4 = arith.constant 6.400000e+01 : f32
    %6 = vector.broadcast %cst_4 : f32 to vector<8x1xf32>
    %7 = arith.divf %5, %6 : vector<8x1xf32>
    %cst_5 = arith.constant 9.99999974E-6 : f32
    %8 = vector.broadcast %cst_5 : f32 to vector<8x1xf32>
    %9 = arith.addf %7, %8 : vector<8x1xf32>
    %10 = math.rsqrt %9 : vector<8x1xf32>
    %11 = vector.broadcast %10 : vector<8x1xf32> to vector<8x64xf32>
    %12 = arith.mulf %1, %11 : vector<8x64xf32>
    %13 = vector.broadcast %2 : vector<1x64xf32> to vector<8x64xf32>
    %14 = arith.mulf %12, %13 : vector<8x64xf32>
    %15 = arith.truncf %14 : vector<8x64xf32> to vector<8x64xbf16>
    %c0_6 = arith.constant 0 : index
    %c0_7 = arith.constant 0 : index
    %16 = vector.load %arg3[%c0_6, %c0_7] : memref<64x128xbf16, #tpu.memory_space<vmem>>, vector<64x128xbf16>
    %cst_8 = arith.constant dense<0.000000e+00> : vector<8x128xf32>
    %17 = tpu.matmul %15, %16, %cst_8 {dimension_numbers = #tpu.dot_dimension_numbers<[1], [0], [0], [1], [0, 0, 1, 1], [], []>} : vector<8x64xbf16>, vector<64x128xbf16>, vector<8x128xf32> -> vector<8x128xf32>
    %18 = vector.extract_strided_slice %17 {offsets = [0, 0], sizes = [8, 64], strides = [1, 1]} : vector<8x128xf32> to vector<8x64xf32>
    %19 = vector.extract_strided_slice %17 {offsets = [0, 64], sizes = [8, 32], strides = [1, 1]} : vector<8x128xf32> to vector<8x32xf32>
    %20 = vector.extract_strided_slice %17 {offsets = [0, 96], sizes = [8, 32], strides = [1, 1]} : vector<8x128xf32> to vector<8x32xf32>
    %c0_9 = arith.constant 0 : index
    %c0_10 = arith.constant 0 : index
    %21 = vector.load %arg5[%c0_9, %c0_10] : memref<8x64xf32, #tpu.memory_space<vmem>>, vector<8x64xf32>
    %c0_11 = arith.constant 0 : index
    %c0_12 = arith.constant 0 : index
    %22 = vector.load %arg6[%c0_11, %c0_12] : memref<8x64xf32, #tpu.memory_space<vmem>>, vector<8x64xf32>
    %c0_13 = arith.constant 0 : index
    %c0_14 = arith.constant 0 : index
    %23 = vector.load %arg7[%c0_13, %c0_14] : memref<64x64xf32, #tpu.memory_space<vmem>>, vector<64x64xf32>
    %24 = arith.mulf %18, %21 : vector<8x64xf32>
    %cst_15 = arith.constant dense<0.000000e+00> : vector<8x64xf32>
    %25 = tpu.matmul %18, %23, %cst_15 {dimension_numbers = #tpu.dot_dimension_numbers<[1], [0], [0], [1], [0, 0, 1, 1], [], []>} : vector<8x64xf32>, vector<64x64xf32>, vector<8x64xf32> -> vector<8x64xf32>
    %26 = arith.mulf %25, %22 : vector<8x64xf32>
    %27 = arith.addf %24, %26 : vector<8x64xf32>
    %28 = vector.extract_strided_slice %21 {offsets = [0, 0], sizes = [8, 32], strides = [1, 1]} : vector<8x64xf32> to vector<8x32xf32>
    %29 = arith.mulf %19, %28 : vector<8x32xf32>
    %30 = vector.extract_strided_slice %23 {offsets = [0, 0], sizes = [32, 32], strides = [1, 1]} : vector<64x64xf32> to vector<32x32xf32>
    %cst_16 = arith.constant dense<0.000000e+00> : vector<8x32xf32>
    %31 = tpu.matmul %19, %30, %cst_16 {dimension_numbers = #tpu.dot_dimension_numbers<[1], [0], [0], [1], [0, 0, 1, 1], [], []>} : vector<8x32xf32>, vector<32x32xf32>, vector<8x32xf32> -> vector<8x32xf32>
    %32 = vector.extract_strided_slice %22 {offsets = [0, 0], sizes = [8, 32], strides = [1, 1]} : vector<8x64xf32> to vector<8x32xf32>
    %33 = arith.mulf %31, %32 : vector<8x32xf32>
    %34 = arith.addf %29, %33 : vector<8x32xf32>
    %35 = tpu.iota {dimensions = array<i32: 0>} : vector<8x8xi32>
    %36 = tpu.iota {dimensions = array<i32: 1>} : vector<8x8xi32>
    %37 = arith.cmpi sle, %36, %35 : vector<8x8xi32>
    %38 = vector.extract_strided_slice %27 {offsets = [0, 0], sizes = [8, 16], strides = [1, 1]} : vector<8x64xf32> to vector<8x16xf32>
    %39 = arith.truncf %38 : vector<8x16xf32> to vector<8x16xbf16>
    %40 = vector.extract_strided_slice %34 {offsets = [0, 0], sizes = [8, 16], strides = [1, 1]} : vector<8x32xf32> to vector<8x16xf32>
    %41 = arith.truncf %40 : vector<8x16xf32> to vector<8x16xbf16>
    %42 = vector.extract_strided_slice %20 {offsets = [0, 0], sizes = [8, 16], strides = [1, 1]} : vector<8x32xf32> to vector<8x16xf32>
    %43 = arith.truncf %42 : vector<8x16xf32> to vector<8x16xbf16>
    %cst_17 = arith.constant dense<0.000000e+00> : vector<8x8xf32>
    %44 = tpu.matmul %39, %41, %cst_17 {dimension_numbers = #tpu.dot_dimension_numbers<[1], [1], [0], [0], [0, 0, 1, 0], [], []>} : vector<8x16xbf16>, vector<8x16xbf16>, vector<8x8xf32> -> vector<8x8xf32>
    %cst_18 = arith.constant 2.500000e-01 : f32
    %45 = vector.broadcast %cst_18 : f32 to vector<8x8xf32>
    %46 = arith.mulf %44, %45 : vector<8x8xf32>
    %cst_19 = arith.constant -1.000000e+30 : f32
    %47 = vector.broadcast %cst_19 : f32 to vector<8x8xf32>
    %48 = arith.select %37, %46, %47 : vector<8x8xi1>, vector<8x8xf32>
    %cst_20 = arith.constant dense<0xFF800000> : vector<8xf32>
    %49 = vector.multi_reduction <maximumf>, %48, %cst_20 [1] : vector<8x8xf32> to vector<8xf32>
    %50 = vector.shape_cast %49 : vector<8xf32> to vector<8x1xf32>
    %51 = vector.broadcast %50 : vector<8x1xf32> to vector<8x8xf32>
    %52 = arith.subf %48, %51 : vector<8x8xf32>
    %53 = math.exp %52 : vector<8x8xf32>
    %cst_21 = arith.constant dense<0.000000e+00> : vector<8xf32>
    %54 = vector.multi_reduction <add>, %53, %cst_21 [1] : vector<8x8xf32> to vector<8xf32>
    %55 = vector.shape_cast %54 : vector<8xf32> to vector<8x1xf32>
    %56 = tpu.reciprocal %55 {approx = true} : vector<8x1xf32> -> vector<8x1xf32>
    %57 = vector.broadcast %56 : vector<8x1xf32> to vector<8x8xf32>
    %58 = arith.mulf %53, %57 : vector<8x8xf32>
    %59 = arith.truncf %58 : vector<8x8xf32> to vector<8x8xbf16>
    %cst_22 = arith.constant dense<0.000000e+00> : vector<8x16xf32>
    %60 = tpu.matmul %59, %43, %cst_22 {dimension_numbers = #tpu.dot_dimension_numbers<[1], [0], [0], [1], [0, 0, 1, 1], [], []>} : vector<8x8xbf16>, vector<8x16xbf16>, vector<8x16xf32> -> vector<8x16xf32>
    %61 = vector.extract_strided_slice %27 {offsets = [0, 16], sizes = [8, 16], strides = [1, 1]} : vector<8x64xf32> to vector<8x16xf32>
    %62 = arith.truncf %61 : vector<8x16xf32> to vector<8x16xbf16>
    %63 = vector.extract_strided_slice %34 {offsets = [0, 0], sizes = [8, 16], strides = [1, 1]} : vector<8x32xf32> to vector<8x16xf32>
    %64 = arith.truncf %63 : vector<8x16xf32> to vector<8x16xbf16>
    %65 = vector.extract_strided_slice %20 {offsets = [0, 0], sizes = [8, 16], strides = [1, 1]} : vector<8x32xf32> to vector<8x16xf32>
    %66 = arith.truncf %65 : vector<8x16xf32> to vector<8x16xbf16>
    %cst_23 = arith.constant dense<0.000000e+00> : vector<8x8xf32>
    %67 = tpu.matmul %62, %64, %cst_23 {dimension_numbers = #tpu.dot_dimension_numbers<[1], [1], [0], [0], [0, 0, 1, 0], [], []>} : vector<8x16xbf16>, vector<8x16xbf16>, vector<8x8xf32> -> vector<8x8xf32>
    %cst_24 = arith.constant 2.500000e-01 : f32
    %68 = vector.broadcast %cst_24 : f32 to vector<8x8xf32>
    %69 = arith.mulf %67, %68 : vector<8x8xf32>
    %cst_25 = arith.constant -1.000000e+30 : f32
    %70 = vector.broadcast %cst_25 : f32 to vector<8x8xf32>
    %71 = arith.select %37, %69, %70 : vector<8x8xi1>, vector<8x8xf32>
    %cst_26 = arith.constant dense<0xFF800000> : vector<8xf32>
    %72 = vector.multi_reduction <maximumf>, %71, %cst_26 [1] : vector<8x8xf32> to vector<8xf32>
    %73 = vector.shape_cast %72 : vector<8xf32> to vector<8x1xf32>
    %74 = vector.broadcast %73 : vector<8x1xf32> to vector<8x8xf32>
    %75 = arith.subf %71, %74 : vector<8x8xf32>
    %76 = math.exp %75 : vector<8x8xf32>
    %cst_27 = arith.constant dense<0.000000e+00> : vector<8xf32>
    %77 = vector.multi_reduction <add>, %76, %cst_27 [1] : vector<8x8xf32> to vector<8xf32>
    %78 = vector.shape_cast %77 : vector<8xf32> to vector<8x1xf32>
    %79 = tpu.reciprocal %78 {approx = true} : vector<8x1xf32> -> vector<8x1xf32>
    %80 = vector.broadcast %79 : vector<8x1xf32> to vector<8x8xf32>
    %81 = arith.mulf %76, %80 : vector<8x8xf32>
    %82 = arith.truncf %81 : vector<8x8xf32> to vector<8x8xbf16>
    %cst_28 = arith.constant dense<0.000000e+00> : vector<8x16xf32>
    %83 = tpu.matmul %82, %66, %cst_28 {dimension_numbers = #tpu.dot_dimension_numbers<[1], [0], [0], [1], [0, 0, 1, 1], [], []>} : vector<8x8xbf16>, vector<8x16xbf16>, vector<8x16xf32> -> vector<8x16xf32>
    %84 = vector.extract_strided_slice %27 {offsets = [0, 32], sizes = [8, 16], strides = [1, 1]} : vector<8x64xf32> to vector<8x16xf32>
    %85 = arith.truncf %84 : vector<8x16xf32> to vector<8x16xbf16>
    %86 = vector.extract_strided_slice %34 {offsets = [0, 16], sizes = [8, 16], strides = [1, 1]} : vector<8x32xf32> to vector<8x16xf32>
    %87 = arith.truncf %86 : vector<8x16xf32> to vector<8x16xbf16>
    %88 = vector.extract_strided_slice %20 {offsets = [0, 16], sizes = [8, 16], strides = [1, 1]} : vector<8x32xf32> to vector<8x16xf32>
    %89 = arith.truncf %88 : vector<8x16xf32> to vector<8x16xbf16>
    %cst_29 = arith.constant dense<0.000000e+00> : vector<8x8xf32>
    %90 = tpu.matmul %85, %87, %cst_29 {dimension_numbers = #tpu.dot_dimension_numbers<[1], [1], [0], [0], [0, 0, 1, 0], [], []>} : vector<8x16xbf16>, vector<8x16xbf16>, vector<8x8xf32> -> vector<8x8xf32>
    %cst_30 = arith.constant 2.500000e-01 : f32
    %91 = vector.broadcast %cst_30 : f32 to vector<8x8xf32>
    %92 = arith.mulf %90, %91 : vector<8x8xf32>
    %cst_31 = arith.constant -1.000000e+30 : f32
    %93 = vector.broadcast %cst_31 : f32 to vector<8x8xf32>
    %94 = arith.select %37, %92, %93 : vector<8x8xi1>, vector<8x8xf32>
    %cst_32 = arith.constant dense<0xFF800000> : vector<8xf32>
    %95 = vector.multi_reduction <maximumf>, %94, %cst_32 [1] : vector<8x8xf32> to vector<8xf32>
    %96 = vector.shape_cast %95 : vector<8xf32> to vector<8x1xf32>
    %97 = vector.broadcast %96 : vector<8x1xf32> to vector<8x8xf32>
    %98 = arith.subf %94, %97 : vector<8x8xf32>
    %99 = math.exp %98 : vector<8x8xf32>
    %cst_33 = arith.constant dense<0.000000e+00> : vector<8xf32>
    %100 = vector.multi_reduction <add>, %99, %cst_33 [1] : vector<8x8xf32> to vector<8xf32>
    %101 = vector.shape_cast %100 : vector<8xf32> to vector<8x1xf32>
    %102 = tpu.reciprocal %101 {approx = true} : vector<8x1xf32> -> vector<8x1xf32>
    %103 = vector.broadcast %102 : vector<8x1xf32> to vector<8x8xf32>
    %104 = arith.mulf %99, %103 : vector<8x8xf32>
    %105 = arith.truncf %104 : vector<8x8xf32> to vector<8x8xbf16>
    %cst_34 = arith.constant dense<0.000000e+00> : vector<8x16xf32>
    %106 = tpu.matmul %105, %89, %cst_34 {dimension_numbers = #tpu.dot_dimension_numbers<[1], [0], [0], [1], [0, 0, 1, 1], [], []>} : vector<8x8xbf16>, vector<8x16xbf16>, vector<8x16xf32> -> vector<8x16xf32>
    %107 = vector.extract_strided_slice %27 {offsets = [0, 48], sizes = [8, 16], strides = [1, 1]} : vector<8x64xf32> to vector<8x16xf32>
    %108 = arith.truncf %107 : vector<8x16xf32> to vector<8x16xbf16>
    %109 = vector.extract_strided_slice %34 {offsets = [0, 16], sizes = [8, 16], strides = [1, 1]} : vector<8x32xf32> to vector<8x16xf32>
    %110 = arith.truncf %109 : vector<8x16xf32> to vector<8x16xbf16>
    %111 = vector.extract_strided_slice %20 {offsets = [0, 16], sizes = [8, 16], strides = [1, 1]} : vector<8x32xf32> to vector<8x16xf32>
    %112 = arith.truncf %111 : vector<8x16xf32> to vector<8x16xbf16>
    %cst_35 = arith.constant dense<0.000000e+00> : vector<8x8xf32>
    %113 = tpu.matmul %108, %110, %cst_35 {dimension_numbers = #tpu.dot_dimension_numbers<[1], [1], [0], [0], [0, 0, 1, 0], [], []>} : vector<8x16xbf16>, vector<8x16xbf16>, vector<8x8xf32> -> vector<8x8xf32>
    %cst_36 = arith.constant 2.500000e-01 : f32
    %114 = vector.broadcast %cst_36 : f32 to vector<8x8xf32>
    %115 = arith.mulf %113, %114 : vector<8x8xf32>
    %cst_37 = arith.constant -1.000000e+30 : f32
    %116 = vector.broadcast %cst_37 : f32 to vector<8x8xf32>
    %117 = arith.select %37, %115, %116 : vector<8x8xi1>, vector<8x8xf32>
    %cst_38 = arith.constant dense<0xFF800000> : vector<8xf32>
    %118 = vector.multi_reduction <maximumf>, %117, %cst_38 [1] : vector<8x8xf32> to vector<8xf32>
    %119 = vector.shape_cast %118 : vector<8xf32> to vector<8x1xf32>
    %120 = vector.broadcast %119 : vector<8x1xf32> to vector<8x8xf32>
    %121 = arith.subf %117, %120 : vector<8x8xf32>
    %122 = math.exp %121 : vector<8x8xf32>
    %cst_39 = arith.constant dense<0.000000e+00> : vector<8xf32>
    %123 = vector.multi_reduction <add>, %122, %cst_39 [1] : vector<8x8xf32> to vector<8xf32>
    %124 = vector.shape_cast %123 : vector<8xf32> to vector<8x1xf32>
    %125 = tpu.reciprocal %124 {approx = true} : vector<8x1xf32> -> vector<8x1xf32>
    %126 = vector.broadcast %125 : vector<8x1xf32> to vector<8x8xf32>
    %127 = arith.mulf %122, %126 : vector<8x8xf32>
    %128 = arith.truncf %127 : vector<8x8xf32> to vector<8x8xbf16>
    %cst_40 = arith.constant dense<0.000000e+00> : vector<8x16xf32>
    %129 = tpu.matmul %128, %112, %cst_40 {dimension_numbers = #tpu.dot_dimension_numbers<[1], [0], [0], [1], [0, 0, 1, 1], [], []>} : vector<8x8xbf16>, vector<8x16xbf16>, vector<8x16xf32> -> vector<8x16xf32>
    %130 = tpu.concatenate %60, %83, %106, %129 in 1 : vector<8x16xf32>, vector<8x16xf32>, vector<8x16xf32>, vector<8x16xf32> -> vector<8x64xf32>
    %131 = arith.truncf %130 : vector<8x64xf32> to vector<8x64xbf16>
    %c0_41 = arith.constant 0 : index
    %c0_42 = arith.constant 0 : index
    %132 = vector.load %arg4[%c0_41, %c0_42] : memref<64x64xbf16, #tpu.memory_space<vmem>>, vector<64x64xbf16>
    %cst_43 = arith.constant dense<0.000000e+00> : vector<8x64xf32>
    %133 = tpu.matmul %131, %132, %cst_43 {dimension_numbers = #tpu.dot_dimension_numbers<[1], [0], [0], [1], [0, 0, 1, 1], [], []>} : vector<8x64xbf16>, vector<64x64xbf16>, vector<8x64xf32> -> vector<8x64xf32>
    %134 = arith.addf %1, %133 : vector<8x64xf32>
    %c0_44 = arith.constant 0 : index
    %c0_45 = arith.constant 0 : index
    %c0_46 = arith.constant 0 : index
    %135 = vector.load %arg8[%c0_44, %c0_45, %c0_46] : memref<1x8x64xf32, #tpu.memory_space<vmem>>, vector<1x8x64xf32>
    %136 = vector.shape_cast %135 : vector<1x8x64xf32> to vector<8x64xf32>
    %137 = vector.shape_cast %134 : vector<8x64xf32> to vector<1x8x64xf32>
    tpu.vector_store %arg8[%c0_44, %c0_45, %c0_46], %137 {strides = array<i32>} : memref<1x8x64xf32, #tpu.memory_space<vmem>>, vector<1x8x64xf32>,
    return
  }
  func.func @transform_0(%arg0: i32) -> (i32, i32, i32) {
    %c0_i32 = arith.constant 0 : i32
    %c0_i32_0 = arith.constant 0 : i32
    %c0_i32_1 = arith.constant 0 : i32
    return %arg0, %c0_i32, %c0_i32_0 : i32, i32, i32
  }
  func.func @transform_1(%arg0: i32) -> (i32, i32) {
    %c0_i32 = arith.constant 0 : i32
    %c0_i32_0 = arith.constant 0 : i32
    %c0_i32_1 = arith.constant 0 : i32
    return %c0_i32, %c0_i32_0 : i32, i32
  }
  func.func @transform_2(%arg0: i32) -> (i32, i32) {
    %c0_i32 = arith.constant 0 : i32
    %c0_i32_0 = arith.constant 0 : i32
    %c0_i32_1 = arith.constant 0 : i32
    return %c0_i32, %c0_i32_0 : i32, i32
  }
  func.func @transform_3(%arg0: i32) -> (i32, i32) {
    %c0_i32 = arith.constant 0 : i32
    %c0_i32_0 = arith.constant 0 : i32
    %c0_i32_1 = arith.constant 0 : i32
    return %c0_i32, %c0_i32_0 : i32, i32
  }
  func.func @transform_4(%arg0: i32) -> (i32, i32) {
    %c0_i32 = arith.constant 0 : i32
    %c0_i32_0 = arith.constant 0 : i32
    %c0_i32_1 = arith.constant 0 : i32
    return %c0_i32, %c0_i32_0 : i32, i32
  }
  func.func @transform_5(%arg0: i32) -> (i32, i32) {
    %c0_i32 = arith.constant 0 : i32
    %c0_i32_0 = arith.constant 0 : i32
    %c0_i32_1 = arith.constant 0 : i32
    return %c0_i32, %c0_i32_0 : i32, i32
  }
  func.func @transform_6(%arg0: i32) -> (i32, i32) {
    %c0_i32 = arith.constant 0 : i32
    %c0_i32_0 = arith.constant 0 : i32
    %c0_i32_1 = arith.constant 0 : i32
    return %c0_i32, %c0_i32_0 : i32, i32
  }
  func.func @transform_7(%arg0: i32) -> (i32, i32, i32) {
    %c0_i32 = arith.constant 0 : i32
    %c0_i32_0 = arith.constant 0 : i32
    %c0_i32_1 = arith.constant 0 : i32
    return %arg0, %c0_i32, %c0_i32_0 : i32, i32, i32
  }
}

module attributes {stable_mosaic.version = 11 : i64} {
  func.func @_final_kernel(%arg0: i32, %arg1: memref<16x64xf32, #tpu.memory_space<vmem>>, %arg2: memref<1x64xf32, #tpu.memory_space<vmem>>, %arg3: memref<64x128xbf16, #tpu.memory_space<vmem>>, %arg4: memref<16x128xf32, #tpu.memory_space<vmem>>) attributes {dimension_semantics = [#tpu.dimension_semantics<parallel>], iteration_bounds = array<i64: 1>, scalar_prefetch = 0 : i64, scratch_operands = 0 : i64, tpu.core_type = #tpu.core_type<tc>, window_params = [{transform_indices = @transform_0, window_bounds = array<i64: 16, 64>}, {pipeline_mode = #tpu.pipeline_mode<synchronous>, transform_indices = @transform_1, window_bounds = array<i64: 1, 64>}, {pipeline_mode = #tpu.pipeline_mode<synchronous>, transform_indices = @transform_2, window_bounds = array<i64: 64, 128>}, {transform_indices = @transform_3, window_bounds = array<i64: 16, 128>}]} {
    %c0 = arith.constant 0 : index
    %c0_0 = arith.constant 0 : index
    %0 = vector.load %arg1[%c0, %c0_0] : memref<16x64xf32, #tpu.memory_space<vmem>>, vector<16x64xf32>
    %c0_1 = arith.constant 0 : index
    %c0_2 = arith.constant 0 : index
    %1 = vector.load %arg2[%c0_1, %c0_2] : memref<1x64xf32, #tpu.memory_space<vmem>>, vector<1x64xf32>
    %2 = arith.mulf %0, %0 : vector<16x64xf32>
    %cst = arith.constant dense<0.000000e+00> : vector<16xf32>
    %3 = vector.multi_reduction <add>, %2, %cst [1] : vector<16x64xf32> to vector<16xf32>
    %4 = vector.shape_cast %3 : vector<16xf32> to vector<16x1xf32>
    %cst_3 = arith.constant 6.400000e+01 : f32
    %5 = vector.broadcast %cst_3 : f32 to vector<16x1xf32>
    %6 = arith.divf %4, %5 : vector<16x1xf32>
    %cst_4 = arith.constant 9.99999974E-6 : f32
    %7 = vector.broadcast %cst_4 : f32 to vector<16x1xf32>
    %8 = arith.addf %6, %7 : vector<16x1xf32>
    %9 = math.rsqrt %8 : vector<16x1xf32>
    %10 = vector.broadcast %9 : vector<16x1xf32> to vector<16x64xf32>
    %11 = arith.mulf %0, %10 : vector<16x64xf32>
    %12 = vector.broadcast %1 : vector<1x64xf32> to vector<16x64xf32>
    %13 = arith.mulf %11, %12 : vector<16x64xf32>
    %14 = arith.truncf %13 : vector<16x64xf32> to vector<16x64xbf16>
    %c0_5 = arith.constant 0 : index
    %c0_6 = arith.constant 0 : index
    %15 = vector.load %arg3[%c0_5, %c0_6] : memref<64x128xbf16, #tpu.memory_space<vmem>>, vector<64x128xbf16>
    %cst_7 = arith.constant dense<0.000000e+00> : vector<16x128xf32>
    %16 = tpu.matmul %14, %15, %cst_7 {dimension_numbers = #tpu.dot_dimension_numbers<[1], [0], [0], [1], [0, 0, 1, 1], [], []>} : vector<16x64xbf16>, vector<64x128xbf16>, vector<16x128xf32> -> vector<16x128xf32>
    %c0_8 = arith.constant 0 : index
    %c0_9 = arith.constant 0 : index
    %17 = vector.load %arg4[%c0_8, %c0_9] : memref<16x128xf32, #tpu.memory_space<vmem>>, vector<16x128xf32>
    tpu.vector_store %arg4[%c0_8, %c0_9], %16 {strides = array<i32>} : memref<16x128xf32, #tpu.memory_space<vmem>>, vector<16x128xf32>,
    return
  }
  func.func @transform_0(%arg0: i32) -> (i32, i32) {
    %c0_i32 = arith.constant 0 : i32
    %c0_i32_0 = arith.constant 0 : i32
    return %arg0, %c0_i32 : i32, i32
  }
  func.func @transform_1(%arg0: i32) -> (i32, i32) {
    %c0_i32 = arith.constant 0 : i32
    %c0_i32_0 = arith.constant 0 : i32
    %c0_i32_1 = arith.constant 0 : i32
    return %c0_i32, %c0_i32_0 : i32, i32
  }
  func.func @transform_2(%arg0: i32) -> (i32, i32) {
    %c0_i32 = arith.constant 0 : i32
    %c0_i32_0 = arith.constant 0 : i32
    %c0_i32_1 = arith.constant 0 : i32
    return %c0_i32, %c0_i32_0 : i32, i32
  }
  func.func @transform_3(%arg0: i32) -> (i32, i32) {
    %c0_i32 = arith.constant 0 : i32
    %c0_i32_0 = arith.constant 0 : i32
    return %arg0, %c0_i32 : i32, i32
  }
}

</mosaic_0001>

<bundles_post_ra>
// kernel: tile.14
= control target key start
LH: loop header
LB: loop body
LE: loop exit
PB: predicated region body
PF: predicated region fallthrough
CT: control target
= control target key end

     0   :  { %vm42_vm0 = vcmask 1047556   ;;  %vm44_vm1 = vcmask 130048   ;;  %s93_s22 = smov 16   ;;  %s94_s25 = smov 32   ;;  %vm54_vm2 = vcmask 523648   ;;  %vm64_vm3 = vcmask 392448   ;;  %s146_s0 = inlined_call_operand.vmem [shape: f32[8,4,16], index: 0, kind: input, shape index: {}]   ;;  %s147_s1 = inlined_call_operand.vmem [shape: f32[8,64], index: 1, kind: output, shape index: {}]  }
   0x1   :  { %v82_v0 = vld [vmem:[%s146_s0 + $0x1c] sm:$0xf]  ;;  %v83_v1 = vld [vmem:[%s146_s0 + $0x18] sm:$0xf]  ;;  %v84_v2 = vld [vmem:[%s146_s0 + $0x14] sm:$0xf] }
   0x2   :  { %8 = vst [vmem:[#allocation0 + $0x38] sm:$0xf] %v82_v0  ;;  %13 = vst [vmem:[#allocation0 + $0x30] sm:$0xf] %v83_v1  ;;  %v85_v3 = vld [vmem:[%s146_s0 + $0x10] sm:$0xf] }
   0x3   :  { %18 = vst [vmem:[#allocation0 + $0x28] sm:$0xf] %v84_v2  ;;  %v86_v4 = vld [vmem:[%s146_s0 + $0xc] sm:$0xf]  ;;  %v87_v5 = vld [vmem:[%s146_s0 + $0x8] sm:$0xf] }
   0x4   :  { %23 = vst [vmem:[#allocation0 + $0x20] sm:$0xf] %v85_v3  ;;  %28 = vst [vmem:[#allocation0 + $0x18] sm:$0xf] %v86_v4  ;;  %v88_v6 = vld [vmem:[%s146_s0 + $0x4] sm:$0xf] }
   0x5   :  { %33 = vst [vmem:[#allocation0 + $0x10] sm:$0xf] %v87_v5  ;;  %v38_v7 = vld [vmem:[%s146_s0] sm:$0xf]  ;;  %37 = vst [vmem:[#allocation0 + $0x8] sm:$0xf] %v88_v6 }
   0x6   :  { %39 = vst [vmem:[#allocation0] sm:$0xf] %v38_v7  ;;  %s92_s0 = smov 48   ;;  %vm74_vm4 = vcmask 261248  }
   0xb   :  { %v49_v8 = vld [vmem:[#allocation0 + $0x3] ss:$8 sm:$0xf0]   ;;  %v59_v9 = vld [vmem:[#allocation0 + $0x2] ss:$8 sm:$0xf0]  }
   0xc   :  { %v69_v14 = vld [vmem:[#allocation0 + $0x1] ss:$8 sm:$0xf0]   ;;  %v41_v17 = vld [vmem:[#allocation0] ss:$8 sm:$0xf0]  }
   0xd   :  { %v47_v10 = vld [vmem:[#allocation0 + $0x3] ss:$8 sm:$0xf]   ;;  %v57_v11 = vld [vmem:[#allocation0 + $0x2] ss:$8 sm:$0xf]  }
   0xe   :  { %v51_v12 = vsel %vm42_vm0, %v49_v8, %v47_v10  ;;  %v67_v13 = vld [vmem:[#allocation0 + $0x1] ss:$8 sm:$0xf]   ;;  %v40_v16 = vld [vmem:[#allocation0] ss:$8 sm:$0xf]   ;;  %v61_v18 = vsel %vm42_vm0, %v59_v9, %v57_v11 }
   0xf   :  { %52 = vrot.lane.b32.xlu0 %v51_v12, %s92_s0  ;;  %v71_v15 = vsel %vm42_vm0, %v69_v14, %v67_v13  ;;  %v43_v19 = vsel %vm42_vm0, %v41_v17, %v40_v16 }
  0x10   :  { %72 = vrot.lane.b32.xlu1 %v71_v15, %s93_s22  ;;  %45 = vst.msk [vmem:[%s147_s1] sm:$0xff] %vm44_vm1, %v43_v19  }
  0x13   :  { %62 = vrot.lane.b32.xlu0 %v61_v18, %s94_s25 }
  0x81   :  { %v53_v20 = vpop.permute.xlu0 %52  }
  0x82   :  { %55 = vst.msk [vmem:[%s147_s1] sm:$0xff] %vm54_vm2, %v53_v20   ;;  %v73_v21 = vpop.permute.xlu1 %72  }
  0x85   :  { %v63_v22 = vpop.permute.xlu0 %62  }
  0x86   :  { %65 = vst.msk [vmem:[%s147_s1] sm:$0xff] %vm64_vm3, %v63_v22  }
  0x87   :  { %75 = vst.msk [vmem:[%s147_s1] sm:$0xff] %vm74_vm4, %v73_v21  }

// kernel: transformer_forward.9
= control target key start
LH: loop header
LB: loop body
LE: loop exit
PB: predicated region body
PF: predicated region fallthrough
CT: control target
= control target key end

     0   :  { %vm21_vm0 = vcmask 523264   ;;  %s261_s0 = inlined_call_operand.vmem [shape: f32[16,64], index: 0, kind: input, shape index: {}]   ;;  %s262_s1 = inlined_call_operand.vmem [shape: f32[1,64], index: 1, kind: input, shape index: {}]   ;;  %s263_s2 = inlined_call_operand.vmem [shape: bf16[64,128], index: 2, kind: input, shape index: {}]   ;;  %s264_s3 = inlined_call_operand.hbm [shape: f32[16,128], index: 3, kind: output, shape index: {}]  }
   0x1   :  { %v16_v0 = vld [vmem:[%s261_s0] sm:$0xff]  ;;  %v17_v1 = vld [vmem:[%s261_s0 + $0x8] sm:$0xff] }
   0x2   :  { %v19_v2 = vmul.f32 %v16_v0, %v16_v0  ;;  %v20_v3 = vmul.f32 %v17_v1, %v17_v1 }
   0x4   :  { %v22_v4 = vsel %vm21_vm0, %v19_v2, 0.0 }
   0x5   :  { %8 = vsyncpa [#allocation3], 0  ;;  %23 = vadd.xlane.f32.xlu0 %v22_v4  ;;  %v25_v5 = vsel %vm21_vm0, %v20_v3, 0.0  ;;  %v168_v6 = vld [vmem:[%s263_s2] sm:$0xff]   ;;  %v200_v7 = vmov 0.0   ;;  %vm201_vm1 = vmmov 0  }
   0x6   :  { %151 = vmatprep.subr.bf16.mxu0 %v200_v7  ;;  %159 = vmatprep.mubr.msk.bf16.mxu0 %vm201_vm1, %v200_v7  ;;  %v169_v8 = vld [vmem:[%s263_s2 + $0x8] sm:$0xff]   ;;  %v170_v9 = vld [vmem:[%s263_s2 + $0x10] sm:$0xff]   ;;  %v171_v10 = vld [vmem:[%s263_s2 + $0x18] sm:$0xff]   ;;  %s202_s2 = smov [#allocation2]  }
   0x7   :  { %152 = vmatpush3.bf16.msra.mxu0 %v168_v6  ;;  %v140_v20 = vld [vmem:[%s262_s1] ss:$0 sm:$0xff]  ;;  %s129_s25 = sshll.u32 %s202_s2, 4  ;;  %s130_s25 = int_to_ptr.vmem [resolvable:$true] %s129_s25 }
   0x8   :  { %153 = vmatprep.subr.bf16.mxu0 %v200_v7  ;;  %s176_s26 = scalar_lea.vmem %s130_s25, 256  ;;  %p181_p1 = scmp.lt.s32.totalorder %s130_s25, %s130_s25 }
   0x9   :  { %26 = vadd.xlane.f32.xlu0 %v25_v5  ;;  %p177_p0 = scmp.ne.s32.totalorder %s130_s25, %s176_s26  ;;  %p182_p2 = scmp.lt.s32.totalorder %s176_s26, %s176_s26 }
   0xb   :  { %154 = vmatpush3.bf16.msra.mxu0 %v169_v8  ;;  %p183_p3 = por %p182_p2, %p181_p1 }
   0xc   :  { %155 = vmatprep.subr.bf16.mxu0 %v200_v7 }
   0xd   :  { %p184_p4 = pnand %p183_p3, %p177_p0 }
   0xf   :  { %156 = vmatpush3.bf16.msra.mxu0 %v170_v9 }
  0x10   :  { %157 = vmatprep.subr.bf16.mxu0 %v200_v7 }
  0x13   :  { %158 = vmatpush3.bf16.msra.mxu0 %v171_v10 }
  0x92   :  { %v24_v11 = vpop.xlane.xlu0 %23 }
  0x93   :  { %v29_v12 = vmul.f32 0.015625, %v24_v11 }
  0x95   :  { %v31_v13 = vadd.f32 1e-05, %v29_v12 }
  0x96   :  { %v27_v14 = vpop.xlane.xlu0 %26 }
  0x97   :  { %172 = vrsqrt.f32 %v31_v13  ;;  %v30_v15 = vmul.f32 0.015625, %v27_v14 }
  0x99   :  { %v32_v16 = vadd.f32 1e-05, %v30_v15 }
  0x9b   :  { %174 = vrsqrt.f32 %v32_v16 }
  0xa1   :  { %v173_v17 = vpop.eup %172 }
  0xa2   :  { %v35_v18 = vmul.f32 %v173_v17, %v16_v0 }
  0xa4   :  { %v43_v22 = vmul.f32 %v140_v20, %v35_v18 }
  0xa5   :  { %v175_v19 = vpop.eup %174 }
  0xa6   :  { %v36_v21 = vmul.f32 %v175_v19, %v17_v1 }
  0xa8   :  { %v44_v23 = vmul.f32 %v140_v20, %v36_v21 }
  0xaa   :  { %v45_v24 = vpack.c.bf16 %v44_v23, %v43_v22 }
  0xac   :  { %160 = vmatmul.mubr.msk.bf16.vlgmr.msra.gmra.mrb[0].mxu0 %vm21_vm0, %v45_v24 }
 0x17f   :  { %v115_v25 = vpop.f32.mrb[0].mxu0 }
 0x180   :  { %122 = vst [vmem:[#allocation2] sm:$0xff] %v115_v25  ;;  %v161_v26 = vpop.f32.mrb[1].mxu0 }
 0x181   :  { %v118_v27 = vpop.f32.mrb[2].mxu0 }
 0x182   :  { %123 = vst [vmem:[#allocation2 + $0x8] sm:$0xff] %v118_v27  ;;  %v162_v28 = vpop.f32.mrb[3].mxu0 }
 0x183   :  { %187 = shalt.err (!%p184_p4)
}
 0x184   :  { %s188_s28 = scalar_lea.hbm %s264_s3, 256 }
 0x185   :  { %p189_p5 = scmp.ne.s32.totalorder %s264_s3, %s188_s28  ;;  %p192_p6 = scmp.lt.u32.totalorder %s188_s28, %s264_s3 }
 0x187   :  { %p194_p7 = pnand %p192_p6, %p189_p5 }
 0x189   :  { %197 = shalt.err (!%p194_p7)
}
 0x18a   :  { %s203_s6 = smov 128   ;;  %s204_s7 = smov 8  }
 0x18b   :  { %135 = dma.vmem_to_hbm [thread:$0]  %s130_s25, 256, %s264_s3, [#allocation3], %s203_s6, %s203_s6, %s204_s7  }
 0x18c   :  { %198 = dma.done.wait [#allocation3], 256  }
 0x18d   :  { %199 = vsyncadd [#allocation3], 4294967040 }
 0x18e   :  { %139 = vsyncpa [#allocation3], 1 }

// kernel: transformer_forward.6
= control target key start
LH: loop header
LB: loop body
LE: loop exit
PB: predicated region body
PF: predicated region fallthrough
CT: control target
= control target key end

     0   :  { %vm23_vm0 = vcmask 523264   ;;  %v516_v10 = vmov 0   ;;  %v517_v15 = vmov 0.0   ;;  %vm518_vm1 = vmmov 0   ;;  %s519_s9 = smov 64   ;;  %s666_s0 = inlined_call_operand.vmem [shape: f32[16,64], index: 0, kind: input, shape index: {}]   ;;  %s667_s2 = inlined_call_operand.vmem [shape: bf16[64,384], index: 2, kind: input, shape index: {}]   ;;  %s668_s1 = inlined_call_operand.vmem [shape: f32[1,64], index: 1, kind: input, shape index: {}]   ;;  %s669_s3 = inlined_call_operand.vmem [shape: bf16[192,64], index: 3, kind: input, shape index: {}]   ;;  %s670_s4 = inlined_call_operand.vmem [shape: f32[16,64], index: 4, kind: output, shape index: {}]  }
   0x1   :  { %v548_v0 = vld [vmem:[%s666_s0] sm:$0xff]  ;;  %v553_v1 = vld [vmem:[%s666_s0 + $0x8] sm:$0xff]  ;;  %163 = vmatprep.mubr.bf16.mxu1 %v516_v10  ;;  %366 = vmatprep.subr.bf16.mxu0 %v516_v10  ;;  %v476_v12 = vld [vmem:[%s667_s2 + $0x30] ss:$12 sps:$4 sm:$0xff]  }
   0x2   :  { %v21_v2 = vmul.f32 %v548_v0, %v548_v0  ;;  %v22_v3 = vmul.f32 %v553_v1, %v553_v1  ;;  %v468_v6 = vld [vmem:[%s667_s2 + $0x4] ss:$12 sps:$4 sm:$0xff]   ;;  %v470_v7 = vld [vmem:[%s667_s2] ss:$12 sps:$4 sm:$0xff]   ;;  %v471_v8 = vld [vmem:[%s667_s2 + $0x1c] ss:$12 sps:$4 sm:$0xff]  }
   0x3   :  { %131 = vmatprep.subr.bf16.mxu1 %v468_v6  ;;  %v473_v9 = vld [vmem:[%s667_s2 + $0x18] ss:$12 sps:$4 sm:$0xff]   ;;  %v474_v11 = vld [vmem:[%s667_s2 + $0x34] ss:$12 sps:$4 sm:$0xff]   ;;  %v483_v33 = vld [vmem:[%s667_s2 + $0x50] ss:$12 sps:$4 sm:$0xff]  }
   0x4   :  { %v24_v4 = vsel %vm23_vm0, %v21_v2, 0.0  ;;  %v27_v5 = vsel %vm23_vm0, %v22_v3, 0.0  ;;  %132 = vmatpush1.bf16.msra.mxu1 %v470_v7  ;;  %v477_v13 = vld [vmem:[%s667_s2 + $0x4c] ss:$12 sps:$4 sm:$0xff]   ;;  %v479_v14 = vld [vmem:[%s667_s2 + $0x48] ss:$12 sps:$4 sm:$0xff]  }
   0x5   :  { %25 = vadd.xlane.f32.xlu0 %v24_v4  ;;  %133 = vmatprep.subr.bf16.mxu1 %v471_v8  ;;  %v415_v25 = vld [vmem:[%s668_s1] ss:$0 sm:$0xff]  ;;  %v480_v29 = vld [vmem:[%s667_s2 + $0x8] ss:$12 sps:$4 sm:$0xff]   ;;  %v482_v32 = vld [vmem:[%s667_s2 + $0x38] ss:$12 sps:$4 sm:$0xff]  }
   0x6   :  { %v481_v31 = vld [vmem:[%s667_s2 + $0x20] ss:$12 sps:$4 sm:$0xff]   ;;  %v486_v36 = vld [vmem:[%s669_s3 + $0x10] sm:$0xff]   ;;  %v487_v37 = vld [vmem:[%s669_s3 + $0x18] sm:$0xff]  }
   0x7   :  { %v484_v34 = vld [vmem:[%s669_s3] sm:$0xff]   ;;  %v485_v35 = vld [vmem:[%s669_s3 + $0x8] sm:$0xff]   ;;  %v490_v40 = vld [vmem:[%s669_s3 + $0x30] sm:$0xff]  }
   0x8   :  { %134 = vmatpush1.bf16.msra.mxu1 %v473_v9  ;;  %367 = vmatpush1.bf16.msra.mxu0 %v484_v34  ;;  %v488_v38 = vld [vmem:[%s669_s3 + $0x20] sm:$0xff]   ;;  %v489_v39 = vld [vmem:[%s669_s3 + $0x28] sm:$0xff]   ;;  %v491_v41 = vld [vmem:[%s669_s3 + $0x38] sm:$0xff]  }
   0x9   :  { %28 = vadd.xlane.f32.xlu0 %v27_v5  ;;  %135 = vmatprep.subr.bf16.mxu1 %v474_v11  ;;  %v492_v42 = vld [vmem:[%s669_s3 + $0x40] sm:$0xff]   ;;  %v493_v43 = vld [vmem:[%s669_s3 + $0x48] sm:$0xff]   ;;  %v494_v48 = vld [vmem:[%s669_s3 + $0x50] sm:$0xff]  }
   0xa   :  { %368 = vmatprep.subr.bf16.mxu0 %v516_v10  ;;  %v495_v49 = vld [vmem:[%s669_s3 + $0x58] sm:$0xff]  }
   0xc   :  { %136 = vmatpush1.bf16.msra.mxu1 %v476_v12  ;;  %369 = vmatpush1.bf16.msra.mxu0 %v485_v35 }
   0xd   :  { %137 = vmatprep.subr.bf16.mxu1 %v477_v13  ;;  %370 = vmatprep.subr.bf16.mxu0 %v516_v10 }
  0x10   :  { %138 = vmatpush1.bf16.msra.mxu1 %v479_v14  ;;  %371 = vmatpush1.bf16.msra.mxu0 %v486_v36 }
  0x11   :  { %452 = vmatprep.subr.bf16.mxu1 %v517_v15  ;;  %372 = vmatprep.subr.bf16.mxu0 %v516_v10 }
  0x14   :  { %373 = vmatpush1.bf16.msra.mxu0 %v487_v37 }
  0x15   :  { %374 = vmatprep.subr.bf16.mxu0 %v516_v10 }
  0x18   :  { %375 = vmatpush1.bf16.msra.mxu0 %v488_v38 }
  0x19   :  { %376 = vmatprep.subr.bf16.mxu0 %v516_v10 }
  0x1c   :  { %377 = vmatpush1.bf16.msra.mxu0 %v489_v39 }
  0x1d   :  { %378 = vmatprep.subr.bf16.mxu0 %v516_v10 }
  0x20   :  { %379 = vmatpush1.bf16.msra.mxu0 %v490_v40 }
  0x21   :  { %380 = vmatprep.subr.bf16.mxu0 %v516_v10 }
  0x24   :  { %381 = vmatpush1.bf16.msra.mxu0 %v491_v41 }
  0x25   :  { %382 = vmatprep.subr.bf16.mxu0 %v516_v10 }
  0x28   :  { %383 = vmatpush1.bf16.msra.mxu0 %v492_v42 }
  0x29   :  { %384 = vmatprep.subr.bf16.mxu0 %v516_v10 }
  0x2c   :  { %385 = vmatpush1.bf16.msra.mxu0 %v493_v43 }
  0x2d   :  { %386 = vmatprep.subr.bf16.mxu0 %v516_v10 }
  0x30   :  { %387 = vmatpush1.bf16.msra.mxu0 %v494_v48 }
  0x31   :  { %388 = vmatprep.subr.bf16.mxu0 %v516_v10 }
  0x34   :  { %389 = vmatpush1.bf16.msra.mxu0 %v495_v49 }
  0x92   :  { %v26_v16 = vpop.xlane.xlu0 %25 }
  0x93   :  { %v31_v17 = vmul.f32 0.015625, %v26_v16 }
  0x95   :  { %v33_v18 = vadd.f32 1e-05, %v31_v17 }
  0x96   :  { %v29_v19 = vpop.xlane.xlu0 %28 }
  0x97   :  { %496 = vrsqrt.f32 %v33_v18  ;;  %v32_v20 = vmul.f32 0.015625, %v29_v19 }
  0x99   :  { %v34_v21 = vadd.f32 1e-05, %v32_v20 }
  0x9b   :  { %498 = vrsqrt.f32 %v34_v21 }
  0xa1   :  { %v497_v22 = vpop.eup %496 }
  0xa2   :  { %v37_v23 = vmul.f32 %v497_v22, %v548_v0 }
  0xa4   :  { %v45_v27 = vmul.f32 %v415_v25, %v37_v23 }
  0xa5   :  { %v499_v24 = vpop.eup %498 }
  0xa6   :  { %v38_v26 = vmul.f32 %v499_v24, %v553_v1 }
  0xa8   :  { %v46_v28 = vmul.f32 %v415_v25, %v38_v26 }
  0xaa   :  { %v47_v30 = vpack.c.bf16 %v46_v28, %v45_v27 }
  0xac   :  { %428 = vmatmul.mubr.msk.bf16.vlgmr.msra.gmra.mrb[0].mxu1 %vm23_vm0, %v47_v30 }
  0xad   :  { %453 = vmatpush3.bf16.msra.mxu1 %v480_v29  ;;  %460 = vmatprep.mubr.msk.bf16.mxu1 %vm518_vm1, %v517_v15 }
  0xae   :  { %454 = vmatprep.subr.bf16.mxu1 %v517_v15 }
  0xb1   :  { %455 = vmatpush3.bf16.msra.mxu1 %v481_v31 }
  0xb2   :  { %456 = vmatprep.subr.bf16.mxu1 %v517_v15 }
  0xb5   :  { %457 = vmatpush3.bf16.msra.mxu1 %v482_v32 }
  0xb6   :  { %458 = vmatprep.subr.bf16.mxu1 %v517_v15 }
  0xb9   :  { %459 = vmatpush3.bf16.msra.mxu1 %v483_v33 }
  0xbc   :  { %461 = vmatmul.mubr.msk.bf16.vlgmr.msra.gmra.mrb[4].mxu1 %vm23_vm0, %v47_v30 }
 0x17f   :  { %v165_v44 = vpop.f32.mrb[0].mxu1 }
 0x180   :  { %v167_v45 = vpop.f32.mrb[1].mxu1  ;;  %v430_v54 = vmul.f32 -1.442695, %v165_v44 }
 0x181   :  { %247 = vrot.lane.b32.xlu1 %v167_v45, %s519_s9  ;;  %v169_v46 = vpop.f32.mrb[2].mxu1  ;;  %v431_v55 = vmul.f32 -1.442695, %v167_v45 }
 0x182   :  { %v171_v47 = vpop.f32.mrb[3].mxu1  ;;  %v432_v57 = vmul.f32 -1.442695, %v169_v46  ;;  %500 = vpow2.f32 %v430_v54 }
 0x183   :  { %251 = vrot.lane.b32.xlu0 %v171_v47, %s519_s9  ;;  %v433_v56 = vmul.f32 -1.442695, %v171_v47  ;;  %502 = vpow2.f32 %v431_v55 }
 0x185   :  { %504 = vpow2.f32 %v433_v56 }
 0x186   :  { %506 = vpow2.f32 %v432_v57 }
 0x18c   :  { %v501_v58 = vpop.eup %500 }
 0x18d   :  { %v503_v59 = vpop.eup %502  ;;  %v227_v62 = vadd.f32 1.0, %v501_v58 }
 0x18e   :  { %v228_v63 = vadd.f32 1.0, %v503_v59 }
 0x18f   :  { %v208_v50 = vpop.f32.mrb[4].mxu1  ;;  %v505_v60 = vpop.eup %504  ;;  %508 = vrcp.f32 %v227_v62 }
 0x190   :  { %249 = vrot.lane.b32.xlu1 %v208_v50, %s519_s9  ;;  %v462_v51 = vpop.f32.mrb[5].mxu1  ;;  %v507_v61 = vpop.eup %506  ;;  %v230_v2 = vadd.f32 1.0, %v505_v60  ;;  %510 = vrcp.f32 %v228_v63 }
 0x191   :  { %v211_v52 = vpop.f32.mrb[6].mxu1  ;;  %v229_v3 = vadd.f32 1.0, %v507_v61 }
 0x192   :  { %v463_v53 = vpop.f32.mrb[7].mxu1  ;;  %512 = vrcp.f32 %v230_v2 }
 0x193   :  { %514 = vrcp.f32 %v229_v3 }
 0x194   :  { %253 = vrot.lane.b32.xlu1 %v211_v52, %s519_s9 }
 0x199   :  { %v509_v5 = vpop.eup %508 }
 0x19a   :  { %v511_v6 = vpop.eup %510  ;;  %v239_v13 = vmul.f32 %v509_v5, %v165_v44 }
 0x19b   :  { %v240_v10 = vmul.f32 %v511_v6, %v167_v45 }
 0x19c   :  { %v513_v7 = vpop.eup %512 }
 0x19d   :  { %v515_v9 = vpop.eup %514  ;;  %v242_v12 = vmul.f32 %v513_v7, %v171_v47 }
 0x19e   :  { %v241_v14 = vmul.f32 %v515_v9, %v169_v46 }
 0x1f3   :  { %v248_v4 = vpop.permute.xlu1 %247 }
 0x1f5   :  { %v252_v15 = vpop.permute.xlu0 %251 }
 0x202   :  { %v250_v8 = vpop.permute.xlu1 %249 }
 0x203   :  { %v255_v11 = vsel %vm23_vm0, %v248_v4, %v250_v8  ;;  %v262_v17 = vmul.f32 %v250_v8, %v240_v10 }
 0x204   :  { %v261_v20 = vmul.f32 %v255_v11, %v239_v13 }
 0x206   :  { %v254_v16 = vpop.permute.xlu1 %253 }
 0x207   :  { %v256_v18 = vsel %vm23_vm0, %v252_v15, %v254_v16  ;;  %v264_v19 = vmul.f32 %v254_v16, %v242_v12 }
 0x208   :  { %v263_v21 = vmul.f32 %v256_v18, %v241_v14 }
 0x209   :  { %v266_v22 = vpack.c.bf16 %v264_v19, %v262_v17 }
 0x20a   :  { %v265_v23 = vpack.c.bf16 %v263_v21, %v261_v20 }
 0x20b   :  { %446 = vmatprep.mubr.msk.bf16.mxu0 %vm23_vm0, %v266_v22 }
 0x20c   :  { %399 = vmatmul.mubr.bf16.vlgmr.msra.gmra.mrb[0].mxu0 %v265_v23 }
 0x2df   :  { %v400_v24 = vpop.f32.mrb[0].mxu0 }
 0x2e0   :  { %v407_v25 = vadd.f32 %v400_v24, %v548_v0  ;;  %v402_v26 = vpop.f32.mrb[1].mxu0 }
 0x2e1   :  { %v403_v27 = vpop.f32.mrb[2].mxu0 }
 0x2e2   :  { %409 = vst.msk [vmem:[%s670_s4] sm:$0xff] %vm23_vm0, %v407_v25  ;;  %v408_v28 = vadd.f32 %v403_v27, %v553_v1  ;;  %v405_v29 = vpop.f32.mrb[3].mxu0 }
 0x2e4   :  { %410 = vst.msk [vmem:[%s670_s4 + $0x8] sm:$0xff] %vm23_vm0, %v408_v28 }

// kernel: transformer_forward.5
= control target key start
LH: loop header
LB: loop body
LE: loop exit
PB: predicated region body
PF: predicated region fallthrough
CT: control target
= control target key end

     0   :  { %s1421_s24 = smov 0   ;;  %s1611_s0 = inlined_call_operand.vmem [shape: f32[2,8,64], index: 0, kind: input, shape index: {}]   ;;  %s1612_s1 = inlined_call_operand.vmem [shape: f32[1,64], index: 1, kind: input, shape index: {}]   ;;  %s1613_s2 = inlined_call_operand.vmem [shape: bf16[64,128], index: 2, kind: input, shape index: {}]   ;;  %s1614_s3 = inlined_call_operand.vmem [shape: bf16[64,64], index: 3, kind: input, shape index: {}]   ;;  %s1615_s4 = inlined_call_operand.vmem [shape: f32[8,64], index: 4, kind: input, shape index: {}]   ;;  %s1616_s5 = inlined_call_operand.vmem [shape: f32[8,64], index: 5, kind: input, shape index: {}]   ;;  %s1617_s6 = inlined_call_operand.vmem [shape: f32[64,64], index: 6, kind: input, shape index: {}]   ;;  %s1618_s7 = inlined_call_operand.vmem [shape: f32[2,8,64], index: 7, kind: output, shape index: {}]  }
   0x1 LB: > { %s1129_s25 = sadd.s32 4294967295, %s1369_s24   ;;  %p1133_p0 = scmp.ge.s32.totalorder %s1369_s24, 1  ;;  %s1369_s24 = sphi %s1421_s24, %s17_s24  }
   0x2   : > { %p236_p1 = scmp.lt.s32.totalorder %s1369_s24, 3 }
   0x4   : > { %p237_p2 = pnand %p1133_p0, %p236_p1 }
   0x5   : > { %p266_p3 = scmp.lt.s32.totalorder (!%p237_p2), %s1129_s25, 1  ;;  %vm278_vm0 = vcmask (!%p237_p2), 523264   ;;  %v1337_v3 = vld [vmem:[%s1613_s2] sm:$0xff] (!%p237_p2)   ;;  %v1371_v4 = vmov (!%p237_p2), 0.0   ;;  %vm1372_vm1 = vmmov (!%p237_p2), 0   ;;  %v1338_v5 = vld [vmem:[%s1613_s2 + $0x8] sm:$0xff] (!%p237_p2)   ;;  %v542_v52 = vlaneseq (!%p237_p2) }
   0x6   : > { %240 = sbr.rel (%p237_p2) target bundleno = 2597 (0xa25), region = 48  ;;  %1199 = vmatprep.subr.bf16.mxu0 (!%p237_p2), %v1371_v4  ;;  %1207 = vmatprep.mubr.msk.bf16.mxu0 (!%p237_p2), %vm1372_vm1, %v1371_v4  ;;  %v1339_v6 = vld [vmem:[%s1613_s2 + $0x10] sm:$0xff] (!%p237_p2)   ;;  %v1340_v7 = vld [vmem:[%s1613_s2 + $0x18] sm:$0xff] (!%p237_p2)   ;;  %v370_v8 = vld [vmem:[%s1615_s4] sm:$0xff] (!%p237_p2)  ;;  %s1373_s21 = smov (!%p237_p2), 64   ;;  %v1374_v11 = vmov (!%p237_p2), 0.0|0.0  }
   0x7   : > { %1200 = vmatpush3.bf16.msra.mxu0 (!%p237_p2), %v1337_v3  ;;  %1227 = vmatprep.mubr.msk.f32.mxu1 (!%p237_p2), %vm1372_vm1, %v1371_v4  ;;  %v372_v9 = vld [vmem:[%s1617_s6] sm:$0xff] (!%p237_p2)  ;;  %v373_v10 = vld [vmem:[%s1617_s6 + $0x8] sm:$0xff] (!%p237_p2)  ;;  %v374_v13 = vld [vmem:[%s1617_s6 + $0x10] sm:$0xff] (!%p237_p2)  ;;  %vm463_vm2 = vcmask (!%p237_p2), 261120   ;;  %vm553_vm3 = vcmask (!%p237_p2), 130048   ;;  %v1516_v53 = vshrl.u32 (!%p237_p2), %v542_v52, 7 }
   0x8   : > { %1201 = vmatprep.subr.bf16.mxu0 (!%p237_p2), %v1371_v4  ;;  %457 = vrot.lane.b32.xlu1 (!%p237_p2), %v370_v8, %s1373_s21  ;;  %v1302_v12 = vpack.c.bf16 (!%p237_p2), %v373_v10, %v372_v9  ;;  %v375_v14 = vld [vmem:[%s1617_s6 + $0x18] sm:$0xff] (!%p237_p2)  ;;  %v376_v16 = vld [vmem:[%s1617_s6 + $0x20] sm:$0xff] (!%p237_p2)  ;;  %v377_v17 = vld [vmem:[%s1617_s6 + $0x28] sm:$0xff] (!%p237_p2)  ;;  %v1518_v54 = vand.u32 (!%p237_p2), 127, %v542_v52  ;;  %vm602_vm5 = vcmask (!%p237_p2), 64512   ;;  %s1375_s18 = smov (!%p237_p2), 32  }
   0x9   : > { %1301 = vmatprep.subr.bf16.mxu1 (!%p237_p2), %v1374_v11  ;;  %v1305_v15 = vpack.c.bf16 (!%p237_p2), %v375_v14, %v374_v13  ;;  %v1308_v18 = vpack.c.bf16 (!%p237_p2), %v377_v17, %v376_v16  ;;  %v378_v19 = vld [vmem:[%s1617_s6 + $0x30] sm:$0xff] (!%p237_p2)  ;;  %v379_v20 = vld [vmem:[%s1617_s6 + $0x38] sm:$0xff] (!%p237_p2)  ;;  %v1136_v26 = vld [vmem:[%s1612_s1] ss:$0 sm:$0xff] (!%p237_p2)  ;;  %s1376_s19 = smov (!%p237_p2), 48   ;;  %s1377_s20 = smov (!%p237_p2), 96  }
   0xa   : > { %1303 = vmatpush3.bf16.msra.mxu1 (!%p237_p2), %v1302_v12  ;;  %v1311_v21 = vpack.c.bf16 (!%p237_p2), %v379_v20, %v378_v19  ;;  %v371_v35 = vld [vmem:[%s1616_s5] sm:$0xff] (!%p237_p2)  ;;  %vm546_vm4 = vcmp.le.s32.totalorder (!%p237_p2), %v1518_v54, %v1516_v53  ;;  %vm621_vm6 = vcmask (!%p237_p2), 1043456   ;;  %s1379_s22 = smov (!%p237_p2), 112   ;;  %s1380_s23 = smov (!%p237_p2), 16   ;;  %vm996_vm7 = vcmask (!%p237_p2), 392192  }
   0xb   : > { %1202 = vmatpush3.bf16.msra.mxu0 (!%p237_p2), %v1338_v5  ;;  %1304 = vmatprep.subr.bf16.mxu1 (!%p237_p2), %v1374_v11 }
   0xc   : > { %1203 = vmatprep.subr.bf16.mxu0 (!%p237_p2), %v1371_v4 }
   0xd   : > { %s1620_s25 = smov (!%p266_p3, %s1129_s25), 1 }
   0xe   : > { %s1134_s26 = sshll.u32 %s1620_s25, 3  ;;  %1306 = vmatpush3.bf16.msra.mxu1 %v1305_v15 }
   0xf   : > { %s269_s29 = scalar_lea.vmem %s1611_s0, %s1134_s26  ;;  %1204 = vmatpush3.bf16.msra.mxu0 %v1339_v6  ;;  %1307 = vmatprep.subr.bf16.mxu1 %v1374_v11  ;;  %s273_s14 = scalar_lea.vmem %s1618_s7, %s1134_s26 }
  0x10   : > { %v1437_v0 = vld [vmem:[%s269_s29] sm:$0xff]  ;;  %1205 = vmatprep.subr.bf16.mxu0 %v1371_v4 }
  0x11   : > { %v277_v1 = vmul.f32 %v1437_v0, %v1437_v0 }
  0x12   : > { %1309 = vmatpush3.bf16.msra.mxu1 %v1308_v18 }
  0x13   : > { %v279_v2 = vsel %vm278_vm0, %v277_v1, 0.0  ;;  %1206 = vmatpush3.bf16.msra.mxu0 %v1340_v7  ;;  %1310 = vmatprep.subr.bf16.mxu1 %v1374_v11 }
  0x14   : > { %280 = vadd.xlane.f32.xlu0 %v279_v2  ;;  %1313 = vmatprep.subr.bf16.mxu0 %v1374_v11 }
  0x16   : > { %1312 = vmatpush3.bf16.msra.mxu1 %v1311_v21 }
  0x17   : > { %1241 = vmatprep.subr.bf16.mxu1 %v1371_v4 }
  0x7a   : > { %v458_v44 = vpop.permute.xlu1 %457 }
  0xa1   : > { %v281_v22 = vpop.xlane.xlu0 %280 }
  0xa2   : > { %v283_v23 = vmul.f32 0.015625, %v281_v22 }
  0xa4   : > { %v284_v24 = vadd.f32 1e-05, %v283_v23 }
  0xa6   : > { %1345 = vrsqrt.f32 %v284_v24 }
  0xb0   : > { %v1346_v25 = vpop.eup %1345 }
  0xb1   : > { %v286_v27 = vmul.f32 %v1346_v25, %v1437_v0 }
  0xb3   : > { %v293_v28 = vmul.f32 %v1136_v26, %v286_v27 }
  0xb5   : > { %v294_v29 = vpack.c.bf16 %v293_v28, %v293_v28 }
  0xb7   : > { %1208 = vmatmul.mubr.msk.bf16.vlgmr.msra.gmra.mrb[0].mxu0 %vm278_vm0, %v294_v29 }
  0xb8   : > { %1315 = vmatpush3.bf16.msra.mxu0 %v1302_v12  ;;  %1238 = vmatprep.mubr.msk.f32.mxu0 %vm1372_vm1, %v1371_v4 }
  0xb9   : > { %1316 = vmatprep.subr.bf16.mxu0 %v1374_v11 }
  0xbc   : > { %1318 = vmatpush3.bf16.msra.mxu0 %v1305_v15 }
  0xbd   : > { %1247 = vmatprep.subr.bf16.mxu0 %v1371_v4 }
 0x18a   : > { %v364_v30 = vpop.f32.mrb[0].mxu0 }
 0x18b   : > { %461 = vrot.lane.b32.xlu0 %v364_v30, %s1373_s21  ;;  %v1209_v31 = vpop.f32.mrb[1].mxu0  ;;  %1228 = vmatmul.mubr.msk.f32.vlgmr.msra.gmra.mrb[0].mxu1 %vm278_vm0, %v364_v30  ;;  %v380_v37 = vmul.f32 %v370_v8, %v364_v30  ;;  %v460_v45 = vmul.f32 %v458_v44, %v364_v30  ;;  %v1526_v62 = vpack.c.bf16 %v364_v30, %v364_v30 }
 0x18c   : > { %v367_v32 = vpop.f32.mrb[2].mxu0  ;;  %1243 = vmatprep.mubr.msk.bf16.mxu1 %vm1372_vm1, %v1371_v4 }
 0x18d   : > { %v1210_v33 = vpop.f32.mrb[3].mxu0 }
 0x1fd   : > { %v462_v34 = vpop.permute.xlu0 %461 }
 0x1fe   : > { %1239 = vmatmul.mubr.msk.f32.vlgmr.msra.gmra.mrb[4].mxu0 %vm463_vm2, %v462_v34 }
 0x1ff   : > { %1249 = vmatprep.mubr.msk.bf16.mxu0 %vm1372_vm1, %v1371_v4 }
 0x25e   : > { %v450_v36 = vpop.f32.mrb[0].mxu1 }
 0x25f   : > { %v454_v38 = vmul.f32 %v450_v36, %v371_v35  ;;  %v1229_v39 = vpop.f32.mrb[1].mxu1 }
 0x261   : > { %v455_v40 = vadd.f32 %v454_v38, %v380_v37 }
 0x263   : > { %v547_v51 = vpack.c.bf16 %v455_v40, %v455_v40 }
 0x2d1   : > { %v532_v41 = vpop.f32.mrb[4].mxu0 }
 0x2d2   : > { %v536_v42 = vmul.f32 %v532_v41, %v371_v35  ;;  %v1240_v43 = vpop.f32.mrb[5].mxu0 }
 0x2d4   : > { %538 = vrot.lane.b32.xlu1 %v536_v42, %s1373_s21 }
 0x346   : > { %v539_v46 = vpop.permute.xlu1 %538 }
 0x347   : > { %v541_v47 = vadd.f32 %v539_v46, %v460_v45 }
 0x349   : > { %v548_v48 = vpack.c.bf16 %v541_v47, %v541_v47 }
 0x34b   : > { %551 = vrot.lane.b32.xlu1 %v548_v48, %s1373_s21  ;;  %s1378_s21 = smov 80  }
 0x3bd   : > { %v552_v49 = vpop.permute.xlu1 %551 }
 0x3be   : > { %v558_v50 = vsel %vm553_vm3, %v552_v49, 0 }
 0x3bf   : > { %1242 = vmatpush3.bf16.xpose.msra.mxu1 %v558_v50 }
 0x3c0   : > { %1265 = vmatprep.subr.bf16.mxu1 %v1371_v4 }
 0x3c6   : > { %1244 = vmatmul.mubr.msk.bf16.vlgmr.msra.gmra.mrb[4].mxu1 %vm553_vm3, %v547_v51 }
 0x3c7   : > { %1267 = vmatprep.mubr.msk.bf16.mxu1 %vm1372_vm1, %v1371_v4 }
 0x499   : > { %v594_v55 = vpop.f32.mrb[4].mxu1 }
 0x49a   : > { %v600_v56 = vmul.f32 0.25, %v594_v55  ;;  %v1245_v57 = vpop.f32.mrb[5].mxu1 }
 0x49b   : > { %v597_v58 = vpop.f32.mrb[6].mxu1 }
 0x49c   : > { %v1246_v59 = vpop.f32.mrb[7].mxu1  ;;  %v601_v60 = vsel %vm546_vm4, %v600_v56, -1e+30 }
 0x49d   : > { %v603_v61 = vsel %vm602_vm5, %v601_v60, -inf }
 0x49e   : > { %604 = vmax.xlane.f32.xlu1 %v603_v61 }
 0x4af   : > { %616 = vrot.lane.b32.xlu1 %v1526_v62, %s1375_s18 }
 0x4b3   : > { %770 = vrot.lane.b32.xlu1 %v548_v48, %s1376_s19 }
 0x4b7   : > { %768 = vrot.lane.b32.xlu1 %v547_v51, %s1377_s20 }
 0x4bb   : > { %880 = vrot.lane.b32.xlu1 %v547_v51, %s1378_s21 }
 0x52b   : > { %v605_v63 = vpop.xlane.xlu1 %604 }
 0x52c   : > { %v606_v1 = vsub.f32 %v601_v60, %v605_v63 }
 0x52e   : > { %v607_v2 = vmul.f32 1.442695, %v606_v1 }
 0x52f   : > { %v617_v3 = vpop.permute.xlu1 %616 }
 0x530   : > { %1347 = vpow2.f32 %v607_v2  ;;  %v623_v5 = vsel %vm621_vm6, %v617_v3, 0 }
 0x531   : > { %1248 = vmatpush3.bf16.msra.mxu0 %v623_v5 }
 0x532   : > { %1253 = vmatprep.subr.bf16.mxu0 %v1371_v4 }
 0x533   : > { %v771_v6 = vpop.permute.xlu1 %770 }
 0x534   : > { %v776_v7 = vsel %vm553_vm3, %v771_v6, 0 }
 0x535   : > { %1266 = vmatpush3.bf16.xpose.msra.mxu1 %v776_v7 }
 0x536   : > { %1277 = vmatprep.subr.bf16.mxu1 %v1371_v4 }
 0x537   : > { %v769_v9 = vpop.permute.xlu1 %768 }
 0x53a   : > { %v1348_v8 = vpop.eup %1347 }
 0x53b   : > { %v609_v10 = vsel %vm602_vm5, %v1348_v8, 0.0  ;;  %v881_v11 = vpop.permute.xlu1 %880 }
 0x53c   : > { %610 = vadd.xlane.f32.xlu0 %v609_v10  ;;  %1268 = vmatmul.mubr.msk.bf16.vlgmr.msra.gmra.mrb[8].mxu1 %vm553_vm3, %v769_v9  ;;  %v1341_v9 = vld [vmem:[%s1614_s3] sm:$0xff]   ;;  %v1342_v10 = vld [vmem:[%s1614_s3 + $0x8] sm:$0xff]  }
 0x53d   : > { %1278 = vmatpush3.bf16.xpose.msra.mxu1 %v776_v7  ;;  %1279 = vmatprep.mubr.msk.bf16.mxu1 %vm1372_vm1, %v1371_v4 }
 0x53e   : > { %1289 = vmatprep.subr.bf16.mxu1 %v1371_v4 }
 0x544   : > { %1280 = vmatmul.mubr.msk.bf16.vlgmr.msra.gmra.mrb[12].mxu1 %vm553_vm3, %v881_v11  ;;  %v1343_v11 = vld [vmem:[%s1614_s3 + $0x10] sm:$0xff]  }
 0x545   : > { %1297 = vmatprep.mubr.msk.bf16.mxu1 %vm1372_vm1, %v1371_v4  ;;  %1290 = vmatpush3.bf16.msra.mxu1 %v1341_v9 }
 0x546   : > { %1291 = vmatprep.subr.bf16.mxu1 %v1371_v4 }
 0x549   : > { %1292 = vmatpush3.bf16.msra.mxu1 %v1342_v10 }
 0x54a   : > { %1293 = vmatprep.subr.bf16.mxu1 %v1371_v4 }
 0x54d   : > { %1294 = vmatpush3.bf16.msra.mxu1 %v1343_v11 }
 0x54e   : > { %1295 = vmatprep.subr.bf16.mxu1 %v1371_v4 }
 0x552   : > { %666 = vrot.lane.b32.xlu0 %v547_v51, %s1379_s22 }
 0x5c9   : > { %v611_v12 = vpop.xlane.xlu0 %610 }
 0x5ca   : > { %1349 = vrcp.f32 %v611_v12 }
 0x5cd   : > { %v667_v16 = vpop.permute.xlu0 %666 }
 0x5d4   : > { %v1350_v13 = vpop.eup %1349 }
 0x5d5   : > { %v613_v14 = vmul.f32 %v1350_v13, %v1348_v8 }
 0x5d7   : > { %v614_v15 = vpack.c.bf16 %v613_v14, %v613_v14 }
 0x5d9   : > { %1250 = vmatmul.mubr.msk.bf16.vlgmr.msra.gmra.mrb[8].mxu0 %vm602_vm5, %v614_v15 }
 0x5da   : > { %1254 = vmatpush3.bf16.xpose.msra.mxu0 %v558_v50  ;;  %1255 = vmatprep.mubr.msk.bf16.mxu0 %vm1372_vm1, %v1371_v4 }
 0x5db   : > { %1259 = vmatprep.subr.bf16.mxu0 %v1371_v4 }
 0x5e1   : > { %1256 = vmatmul.mubr.msk.bf16.vlgmr.msra.gmra.mrb[12].mxu0 %vm553_vm3, %v667_v16  ;;  %v1344_v16 = vld [vmem:[%s1614_s3 + $0x18] sm:$0xff]  }
 0x5e2   : > { %1260 = vmatpush3.bf16.msra.mxu0 %v623_v5  ;;  %1261 = vmatprep.mubr.msk.bf16.mxu0 %vm1372_vm1, %v1371_v4 }
 0x5e3   : > { %1271 = vmatprep.subr.bf16.mxu0 %v1371_v4  ;;  %1296 = vmatpush3.bf16.msra.mxu1 %v1344_v16 }
 0x60f   : > { %v812_v17 = vpop.f32.mrb[8].mxu1 }
 0x610   : > { %v818_v18 = vmul.f32 0.25, %v812_v17  ;;  %v1269_v19 = vpop.f32.mrb[9].mxu1 }
 0x611   : > { %v815_v20 = vpop.f32.mrb[10].mxu1 }
 0x612   : > { %v1270_v21 = vpop.f32.mrb[11].mxu1  ;;  %v819_v22 = vsel %vm546_vm4, %v818_v18, -1e+30 }
 0x613   : > { %v820_v23 = vsel %vm602_vm5, %v819_v22, -inf }
 0x614   : > { %821 = vmax.xlane.f32.xlu0 %v820_v23 }
 0x617   : > { %v919_v24 = vpop.f32.mrb[12].mxu1 }
 0x618   : > { %v925_v25 = vmul.f32 0.25, %v919_v24  ;;  %v1281_v26 = vpop.f32.mrb[13].mxu1 }
 0x619   : > { %v922_v27 = vpop.f32.mrb[14].mxu1 }
 0x61a   : > { %v1282_v28 = vpop.f32.mrb[15].mxu1  ;;  %v926_v29 = vsel %vm546_vm4, %v925_v25, -1e+30 }
 0x61b   : > { %v927_v30 = vsel %vm602_vm5, %v926_v29, -inf }
 0x61c   : > { %928 = vmax.xlane.f32.xlu0 %v927_v30 }
 0x6a1   : > { %v822_v31 = vpop.xlane.xlu0 %821 }
 0x6a2   : > { %v823_v32 = vsub.f32 %v819_v22, %v822_v31 }
 0x6a4   : > { %v824_v33 = vmul.f32 1.442695, %v823_v32 }
 0x6a6   : > { %1351 = vpow2.f32 %v824_v33 }
 0x6a9   : > { %v929_v47 = vpop.xlane.xlu0 %928 }
 0x6aa   : > { %v930_v48 = vsub.f32 %v926_v29, %v929_v47 }
 0x6ac   : > { %v1559_v34 = vpop.f32.mrb[8].mxu0  ;;  %v931_v51 = vmul.f32 1.442695, %v930_v48 }
 0x6ad   : > { %v1251_v35 = vpop.f32.mrb[9].mxu0 }
 0x6ae   : > { %v662_v36 = vpop.f32.mrb[10].mxu0 }
 0x6af   : > { %v1252_v37 = vpop.f32.mrb[11].mxu0 }
 0x6b0   : > { %v1352_v38 = vpop.eup %1351 }
 0x6b1   : > { %v826_v39 = vsel %vm602_vm5, %v1352_v38, 0.0 }
 0x6b2   : > { %827 = vadd.xlane.f32.xlu0 %v826_v39 }
 0x6b4   : > { %v705_v40 = vpop.f32.mrb[12].mxu0 }
 0x6b5   : > { %v711_v41 = vmul.f32 0.25, %v705_v40  ;;  %v1257_v42 = vpop.f32.mrb[13].mxu0 }
 0x6b6   : > { %v708_v43 = vpop.f32.mrb[14].mxu0 }
 0x6b7   : > { %v1258_v44 = vpop.f32.mrb[15].mxu0  ;;  %v712_v45 = vsel %vm546_vm4, %v711_v41, -1e+30 }
 0x6b8   : > { %v713_v46 = vsel %vm602_vm5, %v712_v45, -inf }
 0x6b9   : > { %714 = vmax.xlane.f32.xlu1 %v713_v46 }
 0x6c8   : > { %832 = vrot.lane.b32.xlu0 %v1526_v62, %s1380_s23 }
 0x73f   : > { %v828_v58 = vpop.xlane.xlu0 %827 }
 0x743   : > { %v833_v62 = vpop.permute.xlu0 %832 }
 0x744   : > { %v838_v2 = vsel %vm621_vm6, %v833_v62, 0 }
 0x746   : > { %v715_v49 = vpop.xlane.xlu1 %714 }
 0x747   : > { %v716_v50 = vsub.f32 %v712_v45, %v715_v49 }
 0x749   : > { %v717_v52 = vmul.f32 1.442695, %v716_v50 }
 0x74b   : > { %1353 = vpow2.f32 %v717_v52 }
 0x74c   : > { %1355 = vpow2.f32 %v931_v51 }
 0x755   : > { %v1354_v55 = vpop.eup %1353 }
 0x756   : > { %v719_v56 = vsel %vm602_vm5, %v1354_v55, 0.0  ;;  %v1356_v53 = vpop.eup %1355 }
 0x757   : > { %720 = vadd.xlane.f32.xlu1 %v719_v56  ;;  %v933_v54 = vsel %vm602_vm5, %v1356_v53, 0.0 }
 0x75b   : > { %934 = vadd.xlane.f32.xlu1 %v933_v54 }
 0x7e4   : > { %v721_v57 = vpop.xlane.xlu1 %720 }
 0x7e5   : > { %1357 = vrcp.f32 %v721_v57 }
 0x7e6   : > { %1359 = vrcp.f32 %v828_v58 }
 0x7e8   : > { %v935_v59 = vpop.xlane.xlu1 %934 }
 0x7e9   : > { %1361 = vrcp.f32 %v935_v59 }
 0x7ef   : > { %v1358_v60 = vpop.eup %1357 }
 0x7f0   : > { %v723_v61 = vmul.f32 %v1358_v60, %v1354_v55  ;;  %v1360_v1 = vpop.eup %1359 }
 0x7f1   : > { %v830_v3 = vmul.f32 %v1360_v1, %v1352_v38 }
 0x7f2   : > { %v724_v63 = vpack.c.bf16 %v723_v61, %v723_v61 }
 0x7f3   : > { %v831_v5 = vpack.c.bf16 %v830_v3, %v830_v3  ;;  %v1362_v6 = vpop.eup %1361 }
 0x7f4   : > { %1262 = vmatmul.mubr.msk.bf16.vlgmr.msra.gmra.mrb[16].mxu0 %vm602_vm5, %v724_v63  ;;  %v937_v7 = vmul.f32 %v1362_v6, %v1356_v53 }
 0x7f5   : > { %1272 = vmatpush3.bf16.msra.mxu0 %v838_v2  ;;  %1273 = vmatprep.mubr.msk.bf16.mxu0 %vm1372_vm1, %v1371_v4 }
 0x7f6   : > { %1283 = vmatprep.subr.bf16.mxu0 %v1371_v4  ;;  %v938_v8 = vpack.c.bf16 %v937_v7, %v937_v7 }
 0x7fc   : > { %1274 = vmatmul.mubr.msk.bf16.vlgmr.msra.gmra.mrb[20].mxu0 %vm602_vm5, %v831_v5 }
 0x7fd   : > { %1284 = vmatpush3.bf16.msra.mxu0 %v838_v2  ;;  %1285 = vmatprep.mubr.msk.bf16.mxu0 %vm1372_vm1, %v1371_v4 }
 0x804   : > { %1286 = vmatmul.mubr.msk.bf16.vlgmr.msra.gmra.mrb[24].mxu0 %vm602_vm5, %v938_v8 }
 0x8c7   : > { %v762_v12 = vpop.f32.mrb[16].mxu0 }
 0x8c8   : > { %983 = vrot.lane.b32.xlu1 %v762_v12, %s1380_s23  ;;  %v1263_v13 = vpop.f32.mrb[17].mxu0 }
 0x8c9   : > { %v765_v14 = vpop.f32.mrb[18].mxu0 }
 0x8ca   : > { %v1264_v15 = vpop.f32.mrb[19].mxu0 }
 0x8cf   : > { %v874_v17 = vpop.f32.mrb[20].mxu0 }
 0x8d0   : > { %987 = vrot.lane.b32.xlu1 %v874_v17, %s1375_s18  ;;  %v1275_v18 = vpop.f32.mrb[21].mxu0 }
 0x8d1   : > { %v877_v19 = vpop.f32.mrb[22].mxu0 }
 0x8d2   : > { %v1276_v20 = vpop.f32.mrb[23].mxu0 }
 0x8d7   : > { %v976_v21 = vpop.f32.mrb[24].mxu0 }
 0x8d8   : > { %991 = vrot.lane.b32.xlu0 %v976_v21, %s1376_s19  ;;  %v1287_v22 = vpop.f32.mrb[25].mxu0 }
 0x8d9   : > { %v979_v23 = vpop.f32.mrb[26].mxu0 }
 0x8da   : > { %v1288_v24 = vpop.f32.mrb[27].mxu0 }
 0x93a   : > { %v984_v4 = vpop.permute.xlu1 %983 }
 0x93b   : > { %v994_v26 = vsel %vm553_vm3, %v1559_v34, %v984_v4 }
 0x942   : > { %v988_v25 = vpop.permute.xlu1 %987 }
 0x943   : > { %v995_v27 = vsel %vm463_vm2, %v994_v26, %v988_v25 }
 0x94a   : > { %v992_v28 = vpop.permute.xlu0 %991 }
 0x94b   : > { %v997_v29 = vsel %vm996_vm7, %v995_v27, %v992_v28 }
 0x94c   : > { %v998_v30 = vpack.c.bf16 %v997_v29, %v997_v29 }
 0x94e   : > { %1298 = vmatmul.mubr.msk.bf16.vlgmr.msra.gmra.mrb[16].mxu1 %vm278_vm0, %v998_v30 }
 0xa21   : > { %v1068_v31 = vpop.f32.mrb[16].mxu1 }
 0xa22   : > { %v1074_v32 = vadd.f32 %v1068_v31, %v1437_v0  ;;  %v1299_v33 = vpop.f32.mrb[17].mxu1 }
 0xa23   : > { %v1071_v35 = vpop.f32.mrb[18].mxu1 }
 0xa24   : > { %1075 = vst.msk [vmem:[%s273_s14] sm:$0xff] %vm278_vm0, %v1074_v32  ;;  %v1300_v34 = vpop.f32.mrb[19].mxu1 }
 0xa25 PF: > { %s17_s24 = sadd.s32 1, %s1369_s24  }
 0xa26   : > { %p14_p4 = scmp.ge.s32.totalorder %s17_s24, 4  }
 0xa28   :  { %16 = sbr.rel (!%p14_p4) target bundleno = 1 (0x1), region = 78 }

</bundles_post_ra>
